<compile_context>
chip_gen: v6e
topology: v6e:2x2x1
jax: 0.10.0
libtpu: 0.0.40
codegen_flags: <defaults>
</compile_context>

<pallas_src>
import functools

import jax
import jax.numpy as jnp
from jax.experimental import pallas as pl
from jax.experimental.pallas import tpu as pltpu


# {k in 0..2 : floor((phase + k - 1) / 2) == offset}  (nearest-2x tap folding)
_TAP_SETS = {
    (0, -1): (0,), (0, 0): (1, 2), (0, 1): (),
    (1, -1): (),   (1, 0): (0, 1), (1, 1): (2,),
}


def _fold_subpixel_weights(weight_oihw, c_pad, packed):
    """Fold the 3x3 conv weight with the nearest-2x upsample.

    packed=True : (4, 3*Cp, 2*Cp) bf16, index t = pu*2 + r.
        K blocks ordered [d=0 | d=1 | d=2] (column tap dx = d-1),
        N blocks ordered [pv=0 | pv=1] (output column phase).
    packed=False: (4, 2, 2*Cp, Cp) bf16, index [t, pv].
        K blocks for pv=0 are [d=0 | d=1], for pv=1 are [d=1 | d=2]
        (the other tap is structurally zero, so it is simply dropped).
    """
    c_out, c_in, _, _ = weight_oihw.shape
    w_hwio = jnp.transpose(weight_oihw, (2, 3, 1, 0)).astype(jnp.float32)  # ky,kx,ci,co

    def tap(pu, r, d, pv):
        kys = _TAP_SETS[(pu, pu + r - 1)]
        kxs = _TAP_SETS[(pv, d - 1)]
        acc = jnp.zeros((c_in, c_out), jnp.float32)
        for ky in kys:
            for kx in kxs:
                acc = acc + w_hwio[ky, kx]
        return jnp.pad(acc, ((0, c_pad - c_in), (0, c_pad - c_out)))

    mats = []
    for pu in range(2):
        for r in range(2):
            if packed:
                k_blocks = [jnp.concatenate([tap(pu, r, d, 0), tap(pu, r, d, 1)], axis=1)
                            for d in range(3)]
                mats.append(jnp.concatenate(k_blocks, axis=0))       # (3Cp, 2Cp)
            else:
                per_pv = []
                for pv in range(2):
                    ds = (0, 1) if pv == 0 else (1, 2)
                    per_pv.append(jnp.concatenate([tap(pu, r, d, pv) for d in ds],
                                                  axis=0))            # (2Cp, Cp)
                mats.append(jnp.stack(per_pv, axis=0))                # (2, 2Cp, Cp)
    return jnp.stack(mats, axis=0).astype(jnp.bfloat16)


def _upconv_kernel(xw_ref, w_ref, b_ref, o_ref, *, packed):
    # xw_ref : (1, 1, TH+2, W+2, Cp) bf16   pre-windowed padded-input rows
    # w_ref  : packed -> (4, 3Cp, 2Cp) bf16 ; split -> (4, 2, 2Cp, Cp) bf16
    # b_ref  : (1, 2Cp) f32   bias duplicated for both column phases
    # o_ref  : (1, TH, 2, W, 2Cp)  layout [n, a, pu, b, pv*Cp + c]
    th = o_ref.shape[1]
    w = o_ref.shape[3]
    cp = xw_ref.shape[4]

    win = xw_ref[0, 0]                                   # (TH+2, W+2, Cp)
    # im2col along width: the 3 column shifts are concatenated into K so each
    # (pu, r) needs one matmul instead of three + f32 adds. W % 8 == 0 keeps
    # the (rows, W) -> sublane fold layout-free.
    xcat = jnp.concatenate(
        [win[:, d:d + w, :].reshape((th + 2) * w, cp) for d in range(3)],
        axis=-1)                                          # ((TH+2)*W, 3Cp)
    bias = b_ref[...]                                     # (1, 2Cp) f32

    for pu in range(2):                                   # output row phase
        if packed:
            acc = None
            for r in range(2):                            # row tap
                row0 = (pu + r) * w
                patch = xcat[row0:row0 + th * w, :]
                m = jnp.dot(patch, w_ref[pu * 2 + r],
                            preferred_element_type=jnp.float32)
                acc = m if acc is None else acc + m
            acc = acc + bias                              # broadcast (1, 2Cp)
            o_ref[0, :, pu, :, :] = acc.reshape(th, w, 2 * cp).astype(o_ref.dtype)
        else:
            for pv in range(2):                           # output column phase
                acc = None
                for r in range(2):
                    row0 = (pu + r) * w
                    patch = xcat[row0:row0 + th * w, pv * cp:pv * cp + 2 * cp]
                    m = jnp.dot(patch, w_ref[pu * 2 + r, pv],
                                preferred_element_type=jnp.float32)
                    acc = m if acc is None else acc + m
                acc = acc + bias[:, pv * cp:(pv + 1) * cp]
                o_ref[0, :, pu, :, pv * cp:(pv + 1) * cp] = (
                    acc.reshape(th, w, cp).astype(o_ref.dtype))


def _vmem_capacity_bytes():
    try:
        cap = int(pltpu.get_tpu_info().vmem_capacity_bytes)
        if cap > 0:
            return cap
    except Exception:
        pass
    return 64 * 1024 * 1024          # conservative fallback = v7x physical VMEM


def _pick_tile_h(n, h, w, c_pad, packed, out_itemsize, budget_bytes):
    """Largest divisor of H whose per-step working set fits the VMEM budget,
    preferring enough grid steps for pipeline overlap / dual-TC sharding."""
    divisors = [d for d in range(1, h + 1) if h % d == 0]

    weight_elems = (24 if packed else 16) * c_pad * c_pad
    # TODO(synk): single-buffer the grid-resident weight/bias blocks
    # (pipeline_mode=pl.Buffered(1)) once that path is universally supported;
    # for now we simply budget for both buffers.
    resident = 2 * weight_elems * 2 + 2 * (2 * c_pad) * 4

    def usage(th):
        in_blk = (th + 2) * (w + 2) * c_pad * 2           # bf16 window
        out_blk = th * 2 * w * 2 * c_pad * out_itemsize   # output block
        xcat = (th + 2) * w * 3 * c_pad * 2               # in-kernel im2col copy
        acc = th * w * 2 * c_pad * 4                      # live f32 accumulator(s)
        return resident + 2 * (in_blk + out_blk) + xcat + acc

    limit = int(budget_bytes * 0.8)                       # headroom for compiler scratch
    fitting = [d for d in divisors if usage(d) <= limit]
    if not fitting:
        # TODO(synk): add an output-channel (N) grid axis for very large Cp
        # instead of failing; not needed for typical channel counts.
        raise ValueError(
            f"Upsample kernel: no row tile fits VMEM budget ({budget_bytes} B) "
            f"for H={h}, W={w}, Cp={c_pad}.")
    pref = ([d for d in fitting if n * (h // d) >= 4]
            or [d for d in fitting if n * (h // d) >= 2]
            or fitting)
    return max(pref)


def upsample_forward(x_nchw, weight_oihw=None, bias=None, with_conv=True,
                     tile_h=None, packed=None, out_dtype=None):
    """Matches Upsample.forward (NCHW in / NCHW out)."""
    n, c, h, w = x_nchw.shape
    if not with_conv:
        # Nearest-2x only: pure data movement, leave to XLA.
        return jnp.repeat(jnp.repeat(x_nchw, 2, axis=2), 2, axis=3)

    assert weight_oihw is not None and bias is not None
    out_dtype = x_nchw.dtype if out_dtype is None else out_dtype
    c_pad = ((c + 127) // 128) * 128                      # lane-dense channels
    w_al = ((w + 7) // 8) * 8                             # sublane-friendly width

    if packed is None:
        # Cp == 128: pack both column phases into N = 2*Cp so the 256-wide MXU
        # (v6e/v7x) stays full. Cp >= 256: skip the structurally-zero weight
        # halves (1.5x fewer MXU flops).  On v5e forcing packed=False can help.
        packed = c_pad < 256

    # TODO(synk): accept/emit NHWC directly when the surrounding model is NHWC;
    # the transposes below exist only because the module interface is NCHW.
    x_nhwc = jnp.transpose(x_nchw, (0, 2, 3, 1))
    # One fused pad: 1-px spatial zero pad (+ width alignment) + channel pad,
    # then a single bf16 cast for the MXU.
    x_pad = jnp.pad(
        x_nhwc, ((0, 0), (1, 1), (1, 1 + (w_al - w)), (0, c_pad - c))
    ).astype(jnp.bfloat16)                                # (N, H+2, W_al+2, Cp)

    budget = int(_vmem_capacity_bytes() * 0.75)           # gen-aware scoped limit
    th = tile_h if tile_h is not None else _pick_tile_h(
        n, h, w_al, c_pad, packed, jnp.dtype(out_dtype).itemsize, budget)
    assert h % th == 0, (h, th)

    # Pre-window the padded input so each grid step fetches ONE contiguous
    # (TH+2)-row block (rows i*TH .. i*TH+TH+1): no per-step halo DMAs and no
    # in-kernel seam concatenation.  The 2 duplicated rows per tile are
    # negligible vs the output stream.
    row_idx = jnp.arange(h // th)[:, None] * th + jnp.arange(th + 2)[None, :]
    x_win = x_pad[:, row_idx]                             # (N, H/TH, TH+2, W_al+2, Cp)

    w_folded = _fold_subpixel_weights(weight_oihw, c_pad, packed)
    bias_p = jnp.pad(bias.astype(jnp.float32), (0, c_pad - c))
    bias2 = jnp.concatenate([bias_p, bias_p]).reshape(1, 2 * c_pad)

    if packed:
        w_spec = pl.BlockSpec((4, 3 * c_pad, 2 * c_pad), lambda ni, i: (0, 0, 0))
    else:
        w_spec = pl.BlockSpec((4, 2, 2 * c_pad, c_pad), lambda ni, i: (0, 0, 0, 0))

    grid = (n, h // th)
    out = pl.pallas_call(
        functools.partial(_upconv_kernel, packed=packed),
        out_shape=jax.ShapeDtypeStruct((n, h, 2, w_al, 2 * c_pad), out_dtype),
        grid=grid,
        in_specs=[
            pl.BlockSpec((1, 1, th + 2, w_al + 2, c_pad),
                         lambda ni, i: (ni, i, 0, 0, 0)),
            w_spec,
            pl.BlockSpec((1, 2 * c_pad), lambda ni, i: (0, 0)),
        ],
        out_specs=pl.BlockSpec((1, th, 2, w_al, 2 * c_pad),
                               lambda ni, i: (ni, i, 0, 0, 0)),
        compiler_params=pltpu.CompilerParams(
            dimension_semantics=("parallel", "parallel"),
            vmem_limit_bytes=budget,
        ),
    )(x_win, w_folded, bias2)

    # Free row-major reshapes: (N,H,2,W_al,2Cp) -> (N,2H,2W_al,Cp); crop the
    # width / channel padding and return to NCHW.
    y = out.reshape(n, 2 * h, w_al, 2, c_pad).reshape(n, 2 * h, 2 * w_al, c_pad)
    y = y[:, :, :2 * w, :c]
    return jnp.transpose(y, (0, 3, 1, 2))


if __name__ == "__main__":
    key = jax.random.PRNGKey(0)
    kx, kw, kb = jax.random.split(key, 3)

    N, C, H, W = 2, 4, 16, 16
    x = jax.random.normal(kx, (N, C, H, W), dtype=jnp.float32)
    # Deterministic synthetic params matching nn.Conv2d(C, C, 3, 1, 1) shapes.
    weight = jax.random.normal(kw, (C, C, 3, 3), dtype=jnp.float32) * 0.1
    bias = jax.random.normal(kb, (C,), dtype=jnp.float32) * 0.1

    # Reference: XLA f32 conv on the nearest-upsampled input. The kernel uses
    # bf16 operands with f32 accumulation, so tolerances are loosened.
    up_ref = jnp.repeat(jnp.repeat(x, 2, axis=2), 2, axis=3)
    ref = jax.lax.conv_general_dilated(
        up_ref, weight, window_strides=(1, 1), padding=((1, 1), (1, 1)),
        dimension_numbers=("NCHW", "OIHW", "NCHW"),
    ) + bias[None, :, None, None]

    # Packed path (default at Cp=128).
    out_packed = jax.block_until_ready(upsample_forward(x, weight, bias, with_conv=True))
    assert out_packed.shape == (N, C, 2 * H, 2 * W), out_packed.shape
    err_p = float(jnp.max(jnp.abs(out_packed - ref)))
    assert jnp.allclose(out_packed, ref, atol=3e-2, rtol=3e-2), err_p

    # Split path (skips structurally-zero weight halves; default when Cp >= 256).
    out_split = jax.block_until_ready(
        upsample_forward(x, weight, bias, with_conv=True, packed=False))
    assert out_split.shape == (N, C, 2 * H, 2 * W), out_split.shape
    err_s = float(jnp.max(jnp.abs(out_split - ref)))
    assert jnp.allclose(out_split, ref, atol=3e-2, rtol=3e-2), err_s

    # with_conv=False path (nearest upsample only).
    out_nc = jax.block_until_ready(upsample_forward(x, with_conv=False))
    assert out_nc.shape == (N, C, 2 * H, 2 * W), out_nc.shape
    assert jnp.array_equal(out_nc, up_ref)

    print("KERNEL_OK")
</pallas_src>

<mosaic_0001>
module attributes {stable_mosaic.version = 11 : i64} {
  func.func @_upconv_kernel(%arg0: i32, %arg1: i32, %arg2: memref<1x1x10x18x128xbf16, #tpu.memory_space<vmem>>, %arg3: memref<4x384x256xbf16, #tpu.memory_space<vmem>>, %arg4: memref<1x256xf32, #tpu.memory_space<vmem>>, %arg5: memref<1x8x2x16x256xf32, #tpu.memory_space<vmem>>) attributes {dimension_semantics = [#tpu.dimension_semantics<parallel>, #tpu.dimension_semantics<parallel>], iteration_bounds = array<i64: 2, 2>, scalar_prefetch = 0 : i64, scratch_operands = 0 : i64, tpu.core_type = #tpu.core_type<tc>, window_params = [{transform_indices = @transform_0, window_bounds = array<i64: 1, 1, 10, 18, 128>}, {pipeline_mode = #tpu.pipeline_mode<synchronous>, transform_indices = @transform_1, window_bounds = array<i64: 4, 384, 256>}, {pipeline_mode = #tpu.pipeline_mode<synchronous>, transform_indices = @transform_2, window_bounds = array<i64: 1, 256>}, {transform_indices = @transform_3, window_bounds = array<i64: 1, 8, 2, 16, 256>}]} {
    %c0 = arith.constant 0 : index
    %c0_0 = arith.constant 0 : index
    %c0_1 = arith.constant 0 : index
    %c0_2 = arith.constant 0 : index
    %c0_3 = arith.constant 0 : index
    %0 = vector.load %arg2[%c0, %c0_0, %c0_1, %c0_2, %c0_3] : memref<1x1x10x18x128xbf16, #tpu.memory_space<vmem>>, vector<1x1x10x18x128xbf16>
    %1 = vector.shape_cast %0 : vector<1x1x10x18x128xbf16> to vector<10x18x128xbf16>
    %2 = vector.extract_strided_slice %1 {offsets = [0, 0, 0], sizes = [10, 16, 128], strides = [1, 1, 1]} : vector<10x18x128xbf16> to vector<10x16x128xbf16>
    %3 = vector.shape_cast %2 : vector<10x16x128xbf16> to vector<160x128xbf16>
    %4 = vector.extract_strided_slice %1 {offsets = [0, 1, 0], sizes = [10, 16, 128], strides = [1, 1, 1]} : vector<10x18x128xbf16> to vector<10x16x128xbf16>
    %5 = vector.shape_cast %4 : vector<10x16x128xbf16> to vector<160x128xbf16>
    %6 = vector.extract_strided_slice %1 {offsets = [0, 2, 0], sizes = [10, 16, 128], strides = [1, 1, 1]} : vector<10x18x128xbf16> to vector<10x16x128xbf16>
    %7 = vector.shape_cast %6 : vector<10x16x128xbf16> to vector<160x128xbf16>
    %8 = tpu.concatenate %3, %5, %7 in 1 : vector<160x128xbf16>, vector<160x128xbf16>, vector<160x128xbf16> -> vector<160x384xbf16>
    %c0_4 = arith.constant 0 : index
    %c0_5 = arith.constant 0 : index
    %9 = vector.load %arg4[%c0_4, %c0_5] : memref<1x256xf32, #tpu.memory_space<vmem>>, vector<1x256xf32>
    %10 = vector.extract_strided_slice %8 {offsets = [0, 0], sizes = [128, 384], strides = [1, 1]} : vector<160x384xbf16> to vector<128x384xbf16>
    %c0_6 = arith.constant 0 : index
    %c0_7 = arith.constant 0 : index
    %c0_8 = arith.constant 0 : index
    %11 = vector.load %arg3[%c0_6, %c0_7, %c0_8] : memref<4x384x256xbf16, #tpu.memory_space<vmem>>, vector<1x384x256xbf16>
    %12 = vector.shape_cast %11 : vector<1x384x256xbf16> to vector<384x256xbf16>
    %cst = arith.constant dense<0.000000e+00> : vector<128x256xf32>
    %13 = tpu.matmul %10, %12, %cst {dimension_numbers = #tpu.dot_dimension_numbers<[1], [0], [0], [1], [0, 0, 1, 1], [], []>} : vector<128x384xbf16>, vector<384x256xbf16>, vector<128x256xf32> -> vector<128x256xf32>
    %14 = vector.extract_strided_slice %8 {offsets = [16, 0], sizes = [128, 384], strides = [1, 1]} : vector<160x384xbf16> to vector<128x384xbf16>
    %c1 = arith.constant 1 : index
    %c0_9 = arith.constant 0 : index
    %c0_10 = arith.constant 0 : index
    %15 = vector.load %arg3[%c1, %c0_9, %c0_10] : memref<4x384x256xbf16, #tpu.memory_space<vmem>>, vector<1x384x256xbf16>
    %16 = vector.shape_cast %15 : vector<1x384x256xbf16> to vector<384x256xbf16>
    %cst_11 = arith.constant dense<0.000000e+00> : vector<128x256xf32>
    %17 = tpu.matmul %14, %16, %cst_11 {dimension_numbers = #tpu.dot_dimension_numbers<[1], [0], [0], [1], [0, 0, 1, 1], [], []>} : vector<128x384xbf16>, vector<384x256xbf16>, vector<128x256xf32> -> vector<128x256xf32>
    %18 = arith.addf %13, %17 : vector<128x256xf32>
    %19 = vector.broadcast %9 : vector<1x256xf32> to vector<128x256xf32>
    %20 = arith.addf %18, %19 : vector<128x256xf32>
    %21 = vector.shape_cast %20 : vector<128x256xf32> to vector<8x16x256xf32>
    %c0_12 = arith.constant 0 : index
    %c0_13 = arith.constant 0 : index
    %c0_14 = arith.constant 0 : index
    %c0_15 = arith.constant 0 : index
    %c0_16 = arith.constant 0 : index
    %22 = vector.load %arg5[%c0_12, %c0_13, %c0_14, %c0_15, %c0_16] : memref<1x8x2x16x256xf32, #tpu.memory_space<vmem>>, vector<1x8x1x16x256xf32>
    %23 = vector.shape_cast %22 : vector<1x8x1x16x256xf32> to vector<8x16x256xf32>
    %24 = vector.shape_cast %21 : vector<8x16x256xf32> to vector<1x8x1x16x256xf32>
    tpu.vector_store %arg5[%c0_12, %c0_13, %c0_14, %c0_15, %c0_16], %24 {strides = array<i32>} : memref<1x8x2x16x256xf32, #tpu.memory_space<vmem>>, vector<1x8x1x16x256xf32>,
    %25 = vector.extract_strided_slice %8 {offsets = [16, 0], sizes = [128, 384], strides = [1, 1]} : vector<160x384xbf16> to vector<128x384xbf16>
    %c2 = arith.constant 2 : index
    %c0_17 = arith.constant 0 : index
    %c0_18 = arith.constant 0 : index
    %26 = vector.load %arg3[%c2, %c0_17, %c0_18] : memref<4x384x256xbf16, #tpu.memory_space<vmem>>, vector<1x384x256xbf16>
    %27 = vector.shape_cast %26 : vector<1x384x256xbf16> to vector<384x256xbf16>
    %cst_19 = arith.constant dense<0.000000e+00> : vector<128x256xf32>
    %28 = tpu.matmul %25, %27, %cst_19 {dimension_numbers = #tpu.dot_dimension_numbers<[1], [0], [0], [1], [0, 0, 1, 1], [], []>} : vector<128x384xbf16>, vector<384x256xbf16>, vector<128x256xf32> -> vector<128x256xf32>
    %29 = vector.extract_strided_slice %8 {offsets = [32, 0], sizes = [128, 384], strides = [1, 1]} : vector<160x384xbf16> to vector<128x384xbf16>
    %c3 = arith.constant 3 : index
    %c0_20 = arith.constant 0 : index
    %c0_21 = arith.constant 0 : index
    %30 = vector.load %arg3[%c3, %c0_20, %c0_21] : memref<4x384x256xbf16, #tpu.memory_space<vmem>>, vector<1x384x256xbf16>
    %31 = vector.shape_cast %30 : vector<1x384x256xbf16> to vector<384x256xbf16>
    %cst_22 = arith.constant dense<0.000000e+00> : vector<128x256xf32>
    %32 = tpu.matmul %29, %31, %cst_22 {dimension_numbers = #tpu.dot_dimension_numbers<[1], [0], [0], [1], [0, 0, 1, 1], [], []>} : vector<128x384xbf16>, vector<384x256xbf16>, vector<128x256xf32> -> vector<128x256xf32>
    %33 = arith.addf %28, %32 : vector<128x256xf32>
    %34 = vector.broadcast %9 : vector<1x256xf32> to vector<128x256xf32>
    %35 = arith.addf %33, %34 : vector<128x256xf32>
    %36 = vector.shape_cast %35 : vector<128x256xf32> to vector<8x16x256xf32>
    %c0_23 = arith.constant 0 : index
    %c0_24 = arith.constant 0 : index
    %c1_25 = arith.constant 1 : index
    %c0_26 = arith.constant 0 : index
    %c0_27 = arith.constant 0 : index
    %37 = vector.load %arg5[%c0_23, %c0_24, %c1_25, %c0_26, %c0_27] : memref<1x8x2x16x256xf32, #tpu.memory_space<vmem>>, vector<1x8x1x16x256xf32>
    %38 = vector.shape_cast %37 : vector<1x8x1x16x256xf32> to vector<8x16x256xf32>
    %39 = vector.shape_cast %36 : vector<8x16x256xf32> to vector<1x8x1x16x256xf32>
    tpu.vector_store %arg5[%c0_23, %c0_24, %c1_25, %c0_26, %c0_27], %39 {strides = array<i32>} : memref<1x8x2x16x256xf32, #tpu.memory_space<vmem>>, vector<1x8x1x16x256xf32>,
    return
  }
  func.func @transform_0(%arg0: i32, %arg1: i32) -> (i32, i32, i32, i32, i32) {
    %c0_i32 = arith.constant 0 : i32
    %c0_i32_0 = arith.constant 0 : i32
    %c0_i32_1 = arith.constant 0 : i32
    %c0_i32_2 = arith.constant 0 : i32
    return %arg0, %arg1, %c0_i32, %c0_i32_0, %c0_i32_1 : i32, i32, i32, i32, i32
  }
  func.func @transform_1(%arg0: i32, %arg1: i32) -> (i32, i32, i32) {
    %c0_i32 = arith.constant 0 : i32
    %c0_i32_0 = arith.constant 0 : i32
    %c0_i32_1 = arith.constant 0 : i32
    %c0_i32_2 = arith.constant 0 : i32
    return %c0_i32, %c0_i32_0, %c0_i32_1 : i32, i32, i32
  }
  func.func @transform_2(%arg0: i32, %arg1: i32) -> (i32, i32) {
    %c0_i32 = arith.constant 0 : i32
    %c0_i32_0 = arith.constant 0 : i32
    %c0_i32_1 = arith.constant 0 : i32
    return %c0_i32, %c0_i32_0 : i32, i32
  }
  func.func @transform_3(%arg0: i32, %arg1: i32) -> (i32, i32, i32, i32, i32) {
    %c0_i32 = arith.constant 0 : i32
    %c0_i32_0 = arith.constant 0 : i32
    %c0_i32_1 = arith.constant 0 : i32
    %c0_i32_2 = arith.constant 0 : i32
    return %arg0, %arg1, %c0_i32, %c0_i32_0, %c0_i32_1 : i32, i32, i32, i32, i32
  }
}

</mosaic_0001>

<bundles_post_ra>
// kernel: tpu_custom_call.1
= control target key start
LH: loop header
LB: loop body
LE: loop exit
PB: predicated region body
PF: predicated region fallthrough
CT: control target
= control target key end

     0   :  { %8 = vsyncpa [#allocation3], 0  ;;  %s5214_s0 = inlined_call_operand.vmem [shape: bf16[2,2,10,18,128], index: 0, kind: input, shape index: {}]   ;;  %s5215_s1 = inlined_call_operand.hbm [shape: bf16[4,384,256], index: 1, kind: input, shape index: {}]   ;;  %s5216_s2 = inlined_call_operand.vmem [shape: f32[1,256], index: 2, kind: input, shape index: {}]   ;;  %s5217_s3 = inlined_call_operand.hbm [shape: f32[2,16,2,16,256], index: 3, kind: output, shape index: {}]  }
   0x1   :  { %9 = vsyncpa [#allocation4], 0 }
   0x2   :  { %11 = vsyncpa [#allocation4 + $0x1], 0  ;;  %s3859_s12 = smov 0   ;;  %s3861_s13 = smov 0  }
   0x3   :  { %s3863_s14 = smov 0   ;;  %s3865_s15 = smov 0  }
   0x4   :  { %s3867_s16 = smov 0   ;;  %s3869_s17 = smov 0  }
   0x5   :  { %s3871_s18 = smov 0   ;;  %s3873_s19 = smov 0  }
   0x6 LB: > { %s3024_s20 = sadd.s32 4294967295, %s3830_s19   ;;  %s3025_s21 = sadd.s32 4294967294, %s3830_s19   ;;  %s3830_s19 = sphi %s3873_s19, %s17_s19   ;;  %s3826_s18 = sphi %s3871_s18, %s5351_s18   ;;  %s3822_s17 = sphi %s3869_s17, %s5350_s17   ;;  %s3818_s16 = sphi %s3867_s16, %s5349_s16   ;;  %s3814_s15 = sphi %s3865_s15, %s5348_s15   ;;  %s3810_s14 = sphi %s3863_s14, %s5347_s14   ;;  %s3806_s13 = sphi %s3861_s13, %s5346_s13   ;;  %s3802_s12 = sphi %s3859_s12, %s5345_s12  }
   0x7   : > { %s26_s22 = sadd.s32 1, %s3822_s17  ;;  %s29_s23 = sadd.s32 1, %s3826_s18 }
   0x8   : > { %p27_p0 = scmp.ge.s32.totalorder %s26_s22, 2  ;;  %s108_s24 = sadd.s32 1, %s3810_s14 }
   0x9   : > { %p118_p1 = scmp.ne.s32.totalorder %s3810_s14, %s3806_s13  ;;  %p119_p2 = scmp.eq.s32.totalorder %s3024_s20, 3 }
   0xa   : > { %s5353_s22 = smov (%p27_p0, %s26_s22), 0  ;;  %s5355_s23 = smov (!%p27_p0, %s29_s23), %s3826_s18 }
   0xb   : > { %s104_s25 = ssub.s32 %s3822_s17, %s5353_s22  ;;  %p3911_p3 = por %p119_p2, %p118_p1 }
   0xc   : > { %p31_p4 = scmp.ge.s32.totalorder %s5355_s23, 2  ;;  %p124_p5 = scmp.ne.s32.totalorder %s3806_s13, %s3802_s12 }
   0xd   : > { %p125_p6 = scmp.eq.s32.totalorder %s3025_s21, 3  ;;  %p3026_p7 = scmp.ge.s32.totalorder %s3830_s19, 1 }
   0xe   : > { %s5357_s23 = smov (%p31_p4, %s5355_s23), 0  ;;  %p132_p9 = scmp.lt.s32.totalorder %s3830_s19, 5 }
   0xf   : > { %p3920_p8 = por %p125_p6, %p124_p5  ;;  %s103_s28 = ssub.s32 %s3826_s18, %s5357_s23 }
  0x10   : > { %s105_s29 = sor.u32 %s104_s25, %s103_s28  ;;  %p3927_p10 = pnand %p3026_p7, %p132_p9 }
  0x11   : > { %p106_p11 = scmp.eq.s32.totalorder %s105_s29, 0  ;;  %p3931_p12 = scmp.eq.s32.totalorder %s3024_s20, 0 }
  0x12   : > { %p3329_p13 = pneg %p3927_p10  ;;  %s3832_s6 = smov [#allocation2]  }
  0x13   : > { %s3938_s5 = scalar_select %p106_p11, %s3810_s14, %s108_s24  }
  0x14   : > { %s144_s7 = sshll.u32 %s3832_s6, 4  ;;  %p3942_p0 = pnand %p3931_p12, %p3329_p13  ;;  %s145_s7 = int_to_ptr.vmem [resolvable:$true] %s144_s7 }
  0x15   : > { %s3719_s9 = scalar_lea.vmem %s145_s7, 24576  ;;  %p3727_p6 = scmp.lt.s32.totalorder %s145_s7, %s145_s7 }
  0x16   : > { %p3710_p1 = pneg %p3942_p0  ;;  %p3720_p2 = scmp.ne.s32.totalorder %s145_s7, %s3719_s9 }
  0x17   : > { %p3728_p7 = scmp.lt.s32.totalorder %s3719_s9, %s3719_s9 }
  0x18   : > { %p3722_p4 = pnand %p3720_p2, %p3710_p1 }
  0x19   : > { %p3729_p9 = por %p3728_p7, %p3727_p6 }
  0x1a   : > { %p3723_p5 = pneg %p3722_p4 }
  0x1c   : > { %p3730_p11 = pnand %p3729_p9, %p3723_p5 }
  0x1e   : > { %3733 = shalt.err (!%p3730_p11)
}
  0x1f   : > { %s3833_s10 = smov 128   ;;  %s3834_s11 = smov 8  }
  0x20   : > { %3332 = dma.hbm_to_vmem [thread:$0]  (!%p3942_p0), %s5215_s1, 24576, %s145_s7, [#allocation3], %s3833_s10, %s3833_s10, %s3834_s11  }
  0x21   : > { %175 = sbr.rel (%p3927_p10) target bundleno = 554 (0x22a), region = 32 }
  0x26   : > { %3793 = dma.done.wait (%p3931_p12), [#allocation3], 24576  }
  0x27   : > { %3795 = vsyncadd (%p3931_p12), [#allocation3], 4294942720  ;;  %v3835_v0 = vmov 0   ;;  %v3410_v1 = vld [vmem:[#allocation2 + $0x1f4] ss:$8 sps:$4 sm:$0xff]   ;;  %p203_p13 = scmp.lt.s32.totalorder %s3818_s16, 1 }
  0x28   : > { %1193 = vmatprep.mubr.bf16.mxu1 %v3835_v0  ;;  %v3412_v2 = vld [vmem:[#allocation2 + $0x2f4] ss:$8 sps:$4 sm:$0xff]   ;;  %p205_p0 = scmp.lt.s32.totalorder %s3814_s15, 1  ;;  %1048 = vmatprep.subr.bf16.mxu0 %v3410_v1  ;;  %v3414_v3 = vld [vmem:[#allocation2 + $0x1f0] ss:$8 sps:$4 sm:$0xff]   ;;  %vm517_vm0 = vcmask 1042432  }
  0x29   : > { %v3415_v4 = vld [vmem:[#allocation2 + $0x2f0] ss:$8 sps:$4 sm:$0xff]   ;;  %1161 = vmatprep.subr.bf16.mxu1 %v3412_v2  ;;  %v3416_v5 = vld [vmem:[#allocation2 + $0x1e4] ss:$8 sps:$4 sm:$0xff]   ;;  %1049 = vmatpush1.bf16.msra.mxu0 %v3414_v3  ;;  %v3420_v7 = vld [vmem:[#allocation2 + $0x1e0] ss:$8 sps:$4 sm:$0xff]  }
  0x2a   : > { %1162 = vmatpush1.bf16.msra.mxu1 %v3415_v4  ;;  %v3418_v6 = vld [vmem:[#allocation2 + $0x2e4] ss:$8 sps:$4 sm:$0xff]   ;;  %s204_s24 = scalar_select %p203_p13, %s3818_s16, 1  ;;  %1050 = vmatprep.subr.bf16.mxu0 %v3416_v5  ;;  %v3421_v8 = vld [vmem:[#allocation2 + $0x2e0] ss:$8 sps:$4 sm:$0xff]   ;;  %vm518_vm1 = vcmask 1046532  }
  0x2b   : > { %s206_s25 = scalar_select %p205_p0, %s3814_s15, 1  ;;  %1163 = vmatprep.subr.bf16.mxu1 %v3418_v6  ;;  %v3422_v9 = vld [vmem:[#allocation2 + $0x1d4] ss:$8 sps:$4 sm:$0xff]   ;;  %v3426_v11 = vld [vmem:[#allocation2 + $0x1d0] ss:$8 sps:$4 sm:$0xff]   ;;  %vm3979_vm2 = vmor %vm517_vm0, %vm518_vm1 }
  0x2c   : > { %v3424_v10 = vld [vmem:[#allocation2 + $0x2d4] ss:$8 sps:$4 sm:$0xff]   ;;  %v3427_v12 = vld [vmem:[#allocation2 + $0x2d0] ss:$8 sps:$4 sm:$0xff]   ;;  %v3428_v13 = vld [vmem:[#allocation2 + $0x1c4] ss:$8 sps:$4 sm:$0xff]  }
  0x2d   : > { %1051 = vmatpush1.bf16.msra.mxu0 %v3420_v7  ;;  %s3322_s28 = smul.u32 60, %s204_s24  ;;  %v3430_v14 = vld [vmem:[#allocation2 + $0x2c4] ss:$8 sps:$4 sm:$0xff]   ;;  %v3432_v15 = vld [vmem:[#allocation2 + $0x1c0] ss:$8 sps:$4 sm:$0xff]   ;;  %s200_s9 = sand.u32 1, %s3806_s13  }
  0x2e   : > { %1164 = vmatpush1.bf16.msra.mxu1 %v3421_v8  ;;  %1052 = vmatprep.subr.bf16.mxu0 %v3422_v9  ;;  %s3321_s29 = smul.u32 30, %s206_s25  ;;  %v3433_v16 = vld [vmem:[#allocation2 + $0x2c0] ss:$8 sps:$4 sm:$0xff]   ;;  %v3434_v17 = vld [vmem:[#allocation2 + $0x1b4] ss:$8 sps:$4 sm:$0xff]   ;;  %s3031_s20 = sshll.u32 %s200_s9, 9 }
  0x2f   : > { %1165 = vmatprep.subr.bf16.mxu1 %v3424_v10  ;;  %v3436_v18 = vld [vmem:[#allocation2 + $0x2b4] ss:$8 sps:$4 sm:$0xff]   ;;  %v3438_v19 = vld [vmem:[#allocation2 + $0x1b0] ss:$8 sps:$4 sm:$0xff]   ;;  %v3440_v21 = vld [vmem:[#allocation2 + $0x1a4] ss:$8 sps:$4 sm:$0xff]  }
  0x30   : > { %s209_s30 = sadd.s32 %s3322_s28, %s3321_s29  ;;  %v3439_v20 = vld [vmem:[#allocation2 + $0x2b0] ss:$8 sps:$4 sm:$0xff]   ;;  %v3442_v22 = vld [vmem:[#allocation2 + $0x2a4] ss:$8 sps:$4 sm:$0xff]   ;;  %v3444_v23 = vld [vmem:[#allocation2 + $0x1a0] ss:$8 sps:$4 sm:$0xff]  }
  0x31   : > { %1053 = vmatpush1.bf16.msra.mxu0 %v3426_v11  ;;  %s3032_s4 = sshll.u32 %s209_s30, 2  ;;  %v3445_v24 = vld [vmem:[#allocation2 + $0x2a0] ss:$8 sps:$4 sm:$0xff]   ;;  %v3446_v25 = vld [vmem:[#allocation2 + $0x194] ss:$8 sps:$4 sm:$0xff]   ;;  %s4664_s21 = scalar_lea.vmem [#allocation5], %s3031_s20 }
  0x32   : > { %1166 = vmatpush1.bf16.msra.mxu1 %v3427_v12  ;;  %1054 = vmatprep.subr.bf16.mxu0 %v3428_v13  ;;  %s3967_s8 = scalar_lea.vmem %s5214_s0, %s3032_s4  ;;  %v3448_v26 = vld [vmem:[#allocation2 + $0x294] ss:$8 sps:$4 sm:$0xff]   ;;  %v3450_v27 = vld [vmem:[#allocation2 + $0x190] ss:$8 sps:$4 sm:$0xff]   ;;  %v3452_v36 = vld [vmem:[#allocation2 + $0x184] ss:$8 sps:$4 sm:$0xff]  }
  0x33   : > { %1167 = vmatprep.subr.bf16.mxu1 %v3430_v14  ;;  %v3970_v28 = vld [vmem:[%s3967_s8 + $0xc] sm:$0xf]  ;;  %v3973_v29 = vld [vmem:[%s3967_s8 + $0x10] sm:$0xf]  ;;  %v3976_v30 = vld [vmem:[%s3967_s8 + $0x14] sm:$0x1] }
  0x34   : > { %v529_v31 = vrot.slane %v3973_v29, 5  ;;  %v3451_v32 = vld [vmem:[#allocation2 + $0x290] ss:$8 sps:$4 sm:$0xff]   ;;  %v3034_v34 = vrot.slane %v3970_v28, 9  ;;  %v532_v35 = vrot.slane %v3976_v30, 5  ;;  %v272_v46 = vshrl.u32 %v3970_v28, 16 }
  0x35   : > { %1055 = vmatpush1.bf16.msra.mxu0 %v3432_v15  ;;  %v3454_v37 = vld [vmem:[#allocation2 + $0x284] ss:$8 sps:$4 sm:$0xff]   ;;  %v3456_v39 = vld [vmem:[#allocation2 + $0x180] ss:$8 sps:$4 sm:$0xff]   ;;  %v3458_v41 = vld [vmem:[#allocation2 + $0x274] ss:$8 sps:$4 sm:$0xff]  }
  0x36   : > { %1168 = vmatpush1.bf16.msra.mxu1 %v3433_v16  ;;  %1056 = vmatprep.subr.bf16.mxu0 %v3434_v17  ;;  %v531_v38 = vrot.slane %v529_v31, 4  ;;  %v3457_v40 = vld [vmem:[#allocation2 + $0x280] ss:$8 sps:$4 sm:$0xff]   ;;  %v530_v42 = vsel %vm3979_vm2, %v3034_v34, %v529_v31  ;;  %v3462_v44 = vld [vmem:[#allocation2 + $0x74] ss:$8 sps:$4 sm:$0xff]   ;;  %v275_v49 = vshll.u32 %v3970_v28, 16 }
  0x37   : > { %1169 = vmatprep.subr.bf16.mxu1 %v3436_v18  ;;  %v3990_v45 = vld [vmem:[%s3967_s8 + $0x18] sm:$0xf]  ;;  %v3994_v47 = vld [vmem:[%s3967_s8 + $0x1c] sm:$0xf]  ;;  %v3997_v48 = vld [vmem:[%s3967_s8 + $0x20] sm:$0x1] }
  0x38   : > { %v533_v43 = vsel %vm3979_vm2, %v531_v38, %v532_v35  ;;  %v3460_v50 = vld [vmem:[#allocation2 + $0x70] ss:$8 sps:$4 sm:$0xff]   ;;  %v536_v51 = vrot.slane %v3994_v47, 5  ;;  %v3464_v54 = vld [vmem:[#allocation2 + $0x264] ss:$8 sps:$4 sm:$0xff]   ;;  %v3035_v55 = vrot.slane %v3990_v45, 9 }
  0x39   : > { %1057 = vmatpush1.bf16.msra.mxu0 %v3438_v19  ;;  %v4001_v52 = vcombine.low %v530_v42, %v533_v43  ;;  %v3463_v53 = vld [vmem:[#allocation2 + $0x270] ss:$8 sps:$4 sm:$0xff]   ;;  %v539_v57 = vrot.slane %v3997_v48, 5  ;;  %v3468_v58 = vld [vmem:[#allocation2 + $0x64] ss:$8 sps:$4 sm:$0xff]   ;;  %v274_v59 = vrot.slane %v272_v46, 4 }
  0x3a   : > { %1170 = vmatpush1.bf16.msra.mxu1 %v3439_v20  ;;  %1058 = vmatprep.subr.bf16.mxu0 %v3440_v21  ;;  %v538_v56 = vrot.slane %v536_v51, 4  ;;  %v277_v60 = vrot.slane %v275_v49, 5  ;;  %v281_v61 = vshll.u32 %v3973_v29, 16  ;;  %v3466_v62 = vld [vmem:[#allocation2 + $0x60] ss:$8 sps:$4 sm:$0xff]   ;;  %v285_v4 = vshrl.u32 %v3973_v29, 16 }
  0x3b   : > { %1171 = vmatprep.subr.bf16.mxu1 %v3442_v22  ;;  %v3469_v63 = vld [vmem:[#allocation2 + $0x260] ss:$8 sps:$4 sm:$0xff]   ;;  %v3470_v1 = vld [vmem:[#allocation2 + $0x254] ss:$8 sps:$4 sm:$0xff]   ;;  %v537_v5 = vsel %vm3979_vm2, %v3035_v55, %v536_v51  ;;  %vm244_vm3 = vsmask.f32 3328 }
  0x3c   : > { %v3474_v2 = vld [vmem:[#allocation2 + $0x54] ss:$8 sps:$4 sm:$0xff]   ;;  %v4008_v3 = vld [vmem:[%s3967_s8 + $0x28] sm:$0xf]  ;;  %v540_v6 = vsel %vm3979_vm2, %v538_v56, %v539_v57  ;;  %v4017_v8 = vld [vmem:[%s3967_s8 + $0x24] sm:$0xf]  ;;  %v278_v10 = vor.u32 %v277_v60, %v274_v59 }
  0x3d   : > { %1059 = vmatpush1.bf16.msra.mxu0 %v3444_v23  ;;  %v543_v7 = vrot.slane %v4008_v3, 5  ;;  %v4020_v9 = vld [vmem:[%s3967_s8 + $0x2c] sm:$0x1]  ;;  %v283_v11 = vrot.slane %v281_v61, 5  ;;  %v3472_v12 = vld [vmem:[#allocation2 + $0x50] ss:$8 sps:$4 sm:$0xff]   ;;  %v4023_v14 = vcombine.low %v537_v5, %v540_v6 }
  0x3e   : > { %1172 = vmatpush1.bf16.msra.mxu1 %v3445_v24  ;;  %1060 = vmatprep.subr.bf16.mxu0 %v3446_v25  ;;  %v3475_v13 = vld [vmem:[#allocation2 + $0x250] ss:$8 sps:$4 sm:$0xff]   ;;  %vm245_vm4 = vsmask.f32 7440  ;;  %v3476_v15 = vld [vmem:[#allocation2 + $0x244] ss:$8 sps:$4 sm:$0xff]  }
  0x3f   : > { %1173 = vmatprep.subr.bf16.mxu1 %v3448_v26  ;;  %v287_v16 = vrot.slane %v285_v4, 4  ;;  %v291_v17 = vshll.u32 %v3976_v30, 16  ;;  %v3036_v18 = vrot.slane %v4017_v8, 9  ;;  %v545_v19 = vrot.slane %v543_v7, 4  ;;  %v3480_v21 = vld [vmem:[#allocation2 + $0x44] ss:$8 sps:$4 sm:$0xff]   ;;  %vm4032_vm5 = vmor %vm244_vm3, %vm245_vm4 }
  0x40   : > { %v546_v20 = vrot.slane %v4020_v9, 5  ;;  %v4029_v22 = vld [vmem:[%s3967_s8 + $0x34] sm:$0xf]  ;;  %v279_v24 = vrot.slane %v278_v10, 4  ;;  %v3478_v26 = vld [vmem:[#allocation2 + $0x40] ss:$8 sps:$4 sm:$0xff]  }
  0x41   : > { %1061 = vmatpush1.bf16.msra.mxu0 %v3450_v27  ;;  %v288_v25 = vor.u32 %v287_v16, %v283_v11  ;;  %v3481_v27 = vld [vmem:[#allocation2 + $0x240] ss:$8 sps:$4 sm:$0xff]   ;;  %v3482_v30 = vld [vmem:[#allocation2 + $0x234] ss:$8 sps:$4 sm:$0xff]   ;;  %v293_v31 = vrot.slane %v291_v17, 5  ;;  %v305_v60 = vshll.u32 %v3994_v47, 16 }
  0x42   : > { %1174 = vmatpush1.bf16.msra.mxu1 %v3451_v32  ;;  %1062 = vmatprep.subr.bf16.mxu0 %v3452_v36  ;;  %v544_v32 = vsel %vm3979_vm2, %v3036_v18, %v543_v7  ;;  %v547_v34 = vsel %vm3979_vm2, %v545_v19, %v546_v20  ;;  %v3486_v35 = vld [vmem:[#allocation2 + $0x34] ss:$8 sps:$4 sm:$0xff]   ;;  %v4042_v36 = vld [vmem:[%s3967_s8 + $0x30] sm:$0xf]  ;;  %v4046_v38 = vld [vmem:[%s3967_s8 + $0x38] sm:$0x1] }
  0x43   : > { %1175 = vmatprep.subr.bf16.mxu1 %v3454_v37  ;;  %v550_v37 = vrot.slane %v4029_v22, 5  ;;  %v3484_v42 = vld [vmem:[#allocation2 + $0x30] ss:$8 sps:$4 sm:$0xff]   ;;  %v3488_v46 = vld [vmem:[#allocation2 + $0x224] ss:$8 sps:$4 sm:$0xff]   ;;  %v3037_v51 = vrot.slane %v4042_v36, 9 }
  0x44   : > { %v3487_v43 = vld [vmem:[#allocation2 + $0x230] ss:$8 sps:$4 sm:$0xff]   ;;  %v3492_v49 = vld [vmem:[#allocation2 + $0x24] ss:$8 sps:$4 sm:$0xff]   ;;  %v4061_v56 = vld [vmem:[%s3967_s8 + $0x40] sm:$0xf] }
  0x45   : > { %1063 = vmatpush1.bf16.msra.mxu0 %v3456_v39  ;;  %v284_v39 = vsel %vm4032_vm5, %v279_v24, %v283_v11  ;;  %v3490_v59 = vld [vmem:[#allocation2 + $0x20] ss:$8 sps:$4 sm:$0xff]   ;;  %v4073_v5 = vld [vmem:[%s3967_s8 + $0x3c] sm:$0xf]  ;;  %v4076_v6 = vld [vmem:[%s3967_s8 + $0x44] sm:$0x1] }
  0x46   : > { %1176 = vmatpush1.bf16.msra.mxu1 %v3457_v40  ;;  %1064 = vmatprep.subr.bf16.mxu0 %v3458_v41  ;;  %v289_v40 = vrot.slane %v288_v25, 4  ;;  %v296_v41 = vshrl.u32 %v3990_v45, 16  ;;  %v3493_v61 = vld [vmem:[#allocation2 + $0x220] ss:$8 sps:$4 sm:$0xff]   ;;  %v557_v7 = vrot.slane %v4061_v56, 5  ;;  %v4079_v10 = vrot.slane %v305_v60, 5 }
  0x47   : > { %1514 = vmatprep.subr.bf16.mxu1 %v3462_v44  ;;  %v4052_v44 = vcombine.low %v544_v32, %v547_v34  ;;  %v3498_v11 = vld [vmem:[#allocation2 + $0x14] ss:$8 sps:$4 sm:$0xff]   ;;  %v3496_v16 = vld [vmem:[#allocation2 + $0x10] ss:$8 sps:$4 sm:$0xff]   ;;  %v4084_v18 = vld [vmem:[%s3967_s8 + $0x4c] sm:$0xf] }
  0x48   : > { %v298_v57 = vrot.slane %v296_v41, 4  ;;  %v3499_v17 = vld [vmem:[#allocation2 + $0x210] ss:$8 sps:$4 sm:$0xff]   ;;  %v3500_v20 = vld [vmem:[#allocation2 + $0x204] ss:$8 sps:$4 sm:$0xff]   ;;  %v3038_v24 = vrot.slane %v4073_v5, 9 }
  0x49   : > { %1194 = vmatmul.mubr.bf16.vlgmr.msra.gmra.mxu1 %v4001_v52  ;;  %1065 = vmatpush2.bf16.msra.mxu0 %v3463_v53  ;;  %v552_v53 = vrot.slane %v550_v37, 4  ;;  %v560_v25 = vrot.slane %v4076_v6, 5  ;;  %v4096_v34 = vld [vmem:[%s3967_s8 + $0x50] sm:$0x1]  ;;  %v329_v41 = vshll.u32 %v4008_v3, 16  ;;  %s3304_s24 = sshll.u32 %s3814_s15, 6 }
  0x4a   : > { %1515 = vmatpush1.bf16.msra.mxu1 %v3460_v50  ;;  %1066 = vmatprep.subr.bf16.mxu0 %v3464_v54  ;;  %v294_v50 = vsel %vm4032_vm5, %v289_v40, %v293_v31  ;;  %v553_v54 = vrot.slane %v4046_v38, 5  ;;  %v4421_v23 = vld [vmem:[#allocation2 + $0x430] ss:$8 sps:$4 sm:$0xff]   ;;  %s3300_s25 = sshll.u32 %s3818_s16, 7  ;;  %s2927_s28 = sshll.u32 %s4664_s21, 4  ;;  %s5153_s28 = int_to_ptr.vmem [resolvable:$true] %s2927_s28 }
  0x4b   : > { %1516 = vmatprep.subr.bf16.mxu1 %v3468_v58  ;;  %1203 = vmatprep.mubr.bf16.mxu1 %v3835_v0  ;;  %v4058_v55 = vcombine.low %v284_v39, %v294_v50  ;;  %v299_v58 = vshll.u32 %v3990_v45, 16  ;;  %v339_v50 = vshll.u32 %v4020_v9, 16  ;;  %s2924_s15 = sadd.s32 %s3304_s24, %s3300_s25  ;;  %s5163_s6 = scalar_lea.sflag [#allocation4], %s200_s9 }
  0x4c   : > { %v554_v4 = vsel %vm3979_vm2, %v552_v53, %v553_v54  ;;  %v3509_v54 = vld [vmem:[#allocation2 + $0xf4] ss:$8 sps:$4 sm:$0xff]   ;;  %s3301_s16 = sshll.u32 %s2924_s15, 7  ;;  %s3734_s7 = scalar_lea.vmem %s5153_s28, 8192 }
  0x4d   : > { %1067 = vmatpush2.bf16.msra.mxu0 %v3469_v63  ;;  %1080 = vmatprep.mubr.bf16.mxu0 %v4058_v55  ;;  %v301_v63 = vrot.slane %v299_v58, 5  ;;  %s5151_s4 = scalar_lea.hbm %s5217_s3, %s3301_s16  ;;  %p3735_p10 = scmp.ne.s32.totalorder %s5153_s28, %s3734_s7 }
  0x4e   : > { %1517 = vmatpush1.bf16.msra.mxu1 %v3466_v62  ;;  %1068 = vmatprep.subr.bf16.mxu0 %v3470_v1  ;;  %v3494_v62 = vld [vmem:[#allocation2 + $0x214] ss:$8 sps:$4 sm:$0xff]   ;;  %v309_v1 = vshrl.u32 %v3994_v47, 16 }
  0x4f   : > { %1518 = vmatprep.subr.bf16.mxu1 %v3474_v2  ;;  %v551_v2 = vsel %vm3979_vm2, %v3037_v51, %v550_v37  ;;  %v323_v37 = vshll.u32 %v4017_v8, 16  ;;  %v558_v51 = vsel %vm3979_vm2, %v3038_v24, %v557_v7  ;;  %p3736_p12 = pnand %p3735_p10, %p3911_p3 }
  0x50   : > { %v4086_v19 = vcombine.low %v551_v2, %v554_v4 }
  0x51   : > { %1204 = vmatmul.mubr.bf16.gmra.mxu1 %v4023_v14  ;;  %1069 = vmatpush2.bf16.msra.mxu0 %v3475_v13  ;;  %v311_v13 = vrot.slane %v309_v1, 4  ;;  %p3737_p1 = pneg %p3736_p12 }
  0x52   : > { %1519 = vmatpush1.bf16.msra.mxu1 %v3472_v12  ;;  %1070 = vmatprep.subr.bf16.mxu0 %v3476_v15  ;;  %v302_v12 = vor.u32 %v301_v63, %v298_v57  ;;  %v315_v15 = vshll.u32 %v3997_v48, 16  ;;  %v559_v48 = vrot.slane %v557_v7, 4  ;;  %v4108_v57 = vrot.slane %v329_v41, 5  ;;  %v3507_v63 = vld [vmem:[#allocation2 + $0xf0] ss:$8 sps:$4 sm:$0xff]  }
  0x53   : > { %1520 = vmatprep.subr.bf16.mxu1 %v3480_v21  ;;  %1213 = vmatprep.mubr.bf16.mxu1 %v3835_v0  ;;  %v3504_v21 = vld [vmem:[#allocation2 + $0x4] ss:$8 sps:$4 sm:$0xff]   ;;  %v4120_v7 = vld [vmem:[%s3967_s8 + $0x54] sm:$0xf] }
  0x54   : > { %v303_v31 = vrot.slane %v302_v12, 4  ;;  %v317_v32 = vrot.slane %v315_v15, 5  ;;  %v561_v53 = vsel %vm3979_vm2, %v559_v48, %v560_v25  ;;  %v344_v12 = vshrl.u32 %v4042_v36, 16 }
  0x55   : > { %1071 = vmatpush2.bf16.msra.mxu0 %v3481_v27  ;;  %v4092_v27 = vld [vmem:[%s3967_s8 + $0x48] sm:$0xf]  ;;  %v4130_v15 = vcombine.low %v558_v51, %v561_v53  ;;  %v347_v25 = vshll.u32 %v4042_v36, 16  ;;  %v363_v53 = vshll.u32 %v4046_v38, 16 }
  0x56   : > { %1521 = vmatpush1.bf16.msra.mxu1 %v3478_v26  ;;  %1072 = vmatprep.subr.bf16.mxu0 %v3482_v30  ;;  %v312_v26 = vor.u32 %v311_v13, %v4079_v10  ;;  %v320_v30 = vshrl.u32 %v4017_v8, 16  ;;  %v3039_v60 = vrot.slane %v4092_v27, 9  ;;  %v308_v1 = vsel %vm4032_vm5, %v303_v31, %v4079_v10 }
  0x57   : > { %1522 = vmatprep.subr.bf16.mxu1 %v3486_v35  ;;  %v564_v35 = vrot.slane %v4084_v18, 5  ;;  %v4128_v13 = vcombine.low %v3970_v28, %v3973_v29  ;;  %v341_v10 = vrot.slane %v339_v50, 5  ;;  %v346_v24 = vrot.slane %v344_v12, 4  ;;  %v3522_v28 = vld [vmem:[#allocation2 + $0x164] ss:$8 sps:$4 sm:$0xff]  }
  0x58   : > { %v313_v39 = vrot.slane %v312_v26, 4  ;;  %v322_v40 = vrot.slane %v320_v30, 4  ;;  %v353_v26 = vshll.u32 %v4029_v22, 16  ;;  %v3040_v29 = vrot.slane %v4120_v7, 9  ;;  %v4156_v50 = vld [vmem:[%s3967_s8 + $0x5c] sm:$0x1] }
  0x59   : > { %1214 = vmatmul.mubr.bf16.gmra.mxu1 %v4052_v44  ;;  %1073 = vmatpush2.bf16.msra.mxu0 %v3487_v43  ;;  %v3502_v43 = vld [vmem:[#allocation2] ss:$8 sps:$4 sm:$0xff]   ;;  %v566_v9 = vrot.slane %v564_v35, 4  ;;  %v357_v31 = vshrl.u32 %v4029_v22, 16  ;;  %v349_v41 = vrot.slane %v347_v25, 5 }
  0x5a   : > { %1523 = vmatpush1.bf16.msra.mxu1 %v3484_v42  ;;  %1074 = vmatprep.subr.bf16.mxu0 %v3488_v46  ;;  %v333_v42 = vshrl.u32 %v4008_v3, 16  ;;  %v3505_v46 = vld [vmem:[#allocation2 + $0x200] ss:$8 sps:$4 sm:$0xff]   ;;  %v318_v2 = vsel %vm4032_vm5, %v313_v39, %v317_v32 }
  0x5b   : > { %1524 = vmatprep.subr.bf16.mxu1 %v3492_v49  ;;  %1223 = vmatprep.mubr.bf16.mxu1 %v3835_v0  ;;  %v325_v49 = vrot.slane %v323_v37, 5  ;;  %v4134_v48 = vcombine.low %v308_v1, %v318_v2  ;;  %v3513_v32 = vld [vmem:[#allocation2 + $0xe0] ss:$8 sps:$4 sm:$0xff]   ;;  %v565_v37 = vsel %vm3979_vm2, %v3039_v60, %v564_v35  ;;  %v359_v51 = vrot.slane %v357_v31, 4  ;;  %v3525_v2 = vld [vmem:[#allocation2 + $0xc4] ss:$8 sps:$4 sm:$0xff]  }
  0x5c   : > { %v335_v58 = vrot.slane %v333_v42, 4  ;;  %v4143_v42 = vrot.slane %v353_v26, 5  ;;  %v4183_v1 = vld [vmem:[%s3967_s8 + $0x68] sm:$0x1]  ;;  %v381_v26 = vshrl.u32 %v4061_v56, 16 }
  0x5d   : > { %1075 = vmatpush2.bf16.msra.mxu0 %v3493_v61  ;;  %v567_v61 = vrot.slane %v4096_v34, 5 }
  0x5e   : > { %1525 = vmatpush1.bf16.msra.mxu1 %v3490_v59  ;;  %1076 = vmatprep.subr.bf16.mxu0 %v3494_v62  ;;  %v3512_v59 = vld [vmem:[#allocation2 + $0x174] ss:$8 sps:$4 sm:$0xff]   ;;  %v326_v62 = vor.u32 %v325_v49, %v322_v40  ;;  %v336_v4 = vor.u32 %v335_v58, %v4108_v57  ;;  %v3520_v40 = vld [vmem:[#allocation2 + $0x160] ss:$8 sps:$4 sm:$0xff]   ;;  %v4165_v58 = vcombine.low %v4017_v8, %v4008_v3  ;;  %v3517_v3 = vld [vmem:[#allocation2 + $0xd0] ss:$8 sps:$4 sm:$0xff]  }
  0x5f   : > { %1526 = vmatprep.subr.bf16.mxu1 %v3498_v11  ;;  %v4123_v11 = vld [vmem:[%s3967_s8 + $0x58] sm:$0xf]  ;;  %v568_v39 = vsel %vm3979_vm2, %v566_v9, %v567_v61  ;;  %v360_v38 = vor.u32 %v359_v51, %v4143_v42  ;;  %v4172_v9 = vld [vmem:[%s3967_s8 + $0x60] sm:$0xf] }
  0x60   : > { %v571_v30 = vrot.slane %v4123_v11, 5  ;;  %v4168_v60 = vcombine.low %v565_v37, %v568_v39  ;;  %v3041_v25 = vrot.slane %v4172_v9, 9  ;;  %v383_v39 = vrot.slane %v381_v26, 4 }
  0x61   : > { %1224 = vmatmul.mubr.bf16.gmra.mxu1 %v4086_v19  ;;  %1077 = vmatpush2.bf16.msra.mxu0 %v3499_v17  ;;  %v327_v17 = vrot.slane %v326_v62, 4 }
  0x62   : > { %1527 = vmatpush1.bf16.msra.mxu1 %v3496_v16  ;;  %1078 = vmatprep.subr.bf16.mxu0 %v3500_v20  ;;  %v3510_v16 = vld [vmem:[#allocation2 + $0x170] ss:$8 sps:$4 sm:$0xff]   ;;  %v3515_v20 = vld [vmem:[#allocation2 + $0xe4] ss:$8 sps:$4 sm:$0xff]   ;;  %v572_v61 = vsel %vm3979_vm2, %v3040_v29, %v571_v30  ;;  %v573_v62 = vrot.slane %v571_v30, 4  ;;  %v581_v30 = vrot.slane %v4183_v1, 5 }
  0x63   : > { %1528 = vmatprep.subr.bf16.mxu1 %v3504_v21  ;;  %1233 = vmatprep.mubr.bf16.mxu1 %v3835_v0  ;;  %v337_v21 = vrot.slane %v336_v4, 4  ;;  %v332_v49 = vsel %vm4032_vm5, %v327_v17, %v4108_v57  ;;  %v350_v57 = vor.u32 %v349_v41, %v346_v24  ;;  %v365_v4 = vrot.slane %v363_v53, 5  ;;  %v4202_v41 = vld [vmem:[%s3967_s8 + $0x8] sm:$0x1] }
  0x64   : > { %v377_v17 = vshll.u32 %v4061_v56, 16  ;;  %v361_v24 = vrot.slane %v360_v38, 4 }
  0x65   : > { %1079 = vmatpush2.bf16.msra.mxu0 %v3505_v46  ;;  %v3519_v46 = vld [vmem:[#allocation2 + $0xd4] ss:$8 sps:$4 sm:$0xff]   ;;  %v342_v35 = vsel %vm4032_vm5, %v337_v21, %v341_v10  ;;  %v4188_v10 = vld [vmem:[%s3967_s8] sm:$0xf]  ;;  %v351_v21 = vrot.slane %v350_v57, 4 }
  0x66   : > { %1529 = vmatpush1.bf16.msra.mxu1 %v3502_v43  ;;  %1627 = vmatprep.subr.bf16.mxu0 %v3512_v59  ;;  %v4146_v43 = vld [vmem:[%s3967_s8 + $0x64] sm:$0xf]  ;;  %v3532_v59 = vld [vmem:[#allocation2 + $0x154] ss:$8 sps:$4 sm:$0xff]   ;;  %v4177_v8 = vcombine.low %v332_v49, %v342_v35  ;;  %v4196_v37 = vrot.slane %v377_v17, 5  ;;  %v248_v49 = vshrl.u32 %v4188_v10, 16 }
  0x67   : > { %1530 = vmatprep.subr.bf16.mxu1 %v3509_v54  ;;  %v4161_v54 = vcombine.low %v3990_v45, %v3994_v47  ;;  %v578_v45 = vrot.slane %v4146_v43, 5  ;;  %v368_v47 = vshrl.u32 %v4073_v5, 16  ;;  %v251_v51 = vshll.u32 %v4188_v10, 16  ;;  %v3523_v57 = vld [vmem:[#allocation2 + $0xc0] ss:$8 sps:$4 sm:$0xff]  }
  0x68   : > { %1081 = vmatmul.mubr.bf16.vlgmr.msra.gmra.mxu0 %v4128_v13  ;;  %v356_v38 = vsel %vm4032_vm5, %v351_v21, %v4143_v42  ;;  %v267_v17 = vshll.u32 %v4202_v41, 16  ;;  %v3540_v21 = vld [vmem:[#allocation2 + $0x140] ss:$8 sps:$4 sm:$0xff]  }
  0x69   : > { %1234 = vmatmul.mubr.bf16.gmra.mxu1 %v4130_v15  ;;  %1628 = vmatpush1.bf16.msra.mxu0 %v3510_v16  ;;  %v370_v12 = vrot.slane %v368_v47, 4  ;;  %v371_v16 = vshll.u32 %v4073_v5, 16  ;;  %v580_v29 = vrot.slane %v578_v45, 4  ;;  %v366_v47 = vsel %vm4032_vm5, %v361_v24, %v365_v4 }
  0x6a   : > { %1531 = vmatpush2.bf16.msra.mxu1 %v3507_v63  ;;  %1090 = vmatprep.mubr.bf16.mxu0 %v4134_v48  ;;  %v574_v63 = vrot.slane %v4156_v50, 5  ;;  %v579_v42 = vsel %vm3979_vm2, %v3041_v25, %v578_v45  ;;  %v405_v45 = vshrl.u32 %v4084_v18, 16  ;;  %v3535_v25 = vld [vmem:[#allocation2 + $0xa4] ss:$8 sps:$4 sm:$0xff]  }
  0x6b   : > { %1532 = vmatprep.subr.bf16.mxu1 %v3515_v20  ;;  %1243 = vmatprep.mubr.bf16.mxu1 %v3835_v0  ;;  %v3530_v20 = vld [vmem:[#allocation2 + $0x150] ss:$8 sps:$4 sm:$0xff]   ;;  %v373_v31 = vrot.slane %v371_v16, 5 }
  0x6c   : > { %1629 = vmatprep.subr.bf16.mxu0 %v3522_v28  ;;  %v4193_v28 = vld [vmem:[%s3967_s8 + $0x4] sm:$0xf] }
  0x6d   : > { %1630 = vmatpush1.bf16.msra.mxu0 %v3520_v40  ;;  %v387_v40 = vshll.u32 %v4076_v6, 16  ;;  %v374_v35 = vor.u32 %v373_v31, %v370_v12  ;;  %v257_v53 = vshll.u32 %v4193_v28, 16  ;;  %v3529_v6 = vld [vmem:[#allocation2 + $0xb4] ss:$8 sps:$4 sm:$0xff]   ;;  %v253_v12 = vrot.slane %v251_v51, 5 }
  0x6e   : > { %1533 = vmatpush2.bf16.msra.mxu1 %v3513_v32  ;;  %1631 = vmatprep.subr.bf16.mxu0 %v3532_v59  ;;  %v575_v32 = vsel %vm3979_vm2, %v573_v62, %v574_v63  ;;  %v261_v59 = vshrl.u32 %v4193_v28, 16  ;;  %v384_v62 = vor.u32 %v383_v39, %v4196_v37  ;;  %v250_v63 = vrot.slane %v248_v49, 4  ;;  %v3527_v31 = vld [vmem:[#allocation2 + $0xb0] ss:$8 sps:$4 sm:$0xff]  }
  0x6f   : > { %1534 = vmatprep.subr.bf16.mxu1 %v3519_v46  ;;  %v3542_v46 = vld [vmem:[#allocation2 + $0x144] ss:$8 sps:$4 sm:$0xff]   ;;  %v4218_v16 = vrot.slane %v257_v53, 5  ;;  %v4221_v26 = vcombine.low %v572_v61, %v575_v32  ;;  %v375_v4 = vrot.slane %v374_v35, 4  ;;  %v389_v24 = vrot.slane %v387_v40, 5 }
  0x70   : > { %1091 = vmatmul.mubr.bf16.gmra.mxu0 %v4161_v54  ;;  %v254_v39 = vor.u32 %v253_v12, %v250_v63  ;;  %v392_v51 = vshrl.u32 %v4092_v27, 16  ;;  %v4227_v53 = vcombine.low %v356_v38, %v366_v47  ;;  %v395_v61 = vshll.u32 %v4092_v27, 16 }
  0x71   : > { %1244 = vmatmul.mubr.bf16.gmra.mxu1 %v4168_v60  ;;  %1100 = vmatprep.mubr.bf16.mxu0 %v4177_v8  ;;  %v582_v32 = vsel %vm3979_vm2, %v580_v29, %v581_v30  ;;  %v407_v63 = vrot.slane %v405_v45, 4  ;;  %v3548_v29 = vld [vmem:[#allocation2 + $0x130] ss:$8 sps:$4 sm:$0xff]   ;;  %v411_v30 = vshll.u32 %v4096_v34, 16  ;;  %v416_v12 = vshrl.u32 %v4120_v7, 16 }
  0x72   : > { %1535 = vmatpush2.bf16.msra.mxu1 %v3517_v3  ;;  %1253 = vmatprep.mubr.bf16.mxu1 %v3835_v0  ;;  %v263_v3 = vrot.slane %v261_v59, 4  ;;  %v255_v40 = vrot.slane %v254_v39, 4  ;;  %v394_v35 = vrot.slane %v392_v51, 4  ;;  %v3533_v59 = vld [vmem:[#allocation2 + $0xa0] ss:$8 sps:$4 sm:$0xff]   ;;  %v397_v38 = vrot.slane %v395_v61, 5 }
  0x73   : > { %1536 = vmatprep.subr.bf16.mxu1 %v3525_v2  ;;  %1632 = vmatpush1.bf16.msra.mxu0 %v3530_v20  ;;  %v385_v2 = vrot.slane %v384_v62, 4  ;;  %v401_v20 = vshll.u32 %v4084_v18, 16  ;;  %v425_v34 = vshll.u32 %v4123_v11, 16  ;;  %v4255_v51 = vcombine.low %v579_v42, %v582_v32  ;;  %v3537_v61 = vld [vmem:[#allocation2 + $0x90] ss:$8 sps:$4 sm:$0xff]  }
  0x74   : > { %1633 = vmatprep.subr.bf16.mxu0 %v3542_v46  ;;  %v264_v49 = vor.u32 %v263_v3, %v4218_v16  ;;  %v269_v46 = vrot.slane %v267_v17, 5  ;;  %v419_v3 = vshll.u32 %v4120_v7, 16  ;;  %v413_v45 = vrot.slane %v411_v30, 5 }
  0x75   : > { %v4234_v47 = vrot.slane %v401_v20, 5  ;;  %v390_v17 = vsel %vm4032_vm5, %v385_v2, %v389_v24  ;;  %v260_v24 = vsel %vm4032_vm5, %v255_v40, %v4218_v16  ;;  %v4264_v42 = vrot.slane %v425_v34, 5  ;;  %v3545_v16 = vld [vmem:[#allocation2 + $0x84] ss:$8 sps:$4 sm:$0xff]  }
  0x76   : > { %1537 = vmatpush2.bf16.msra.mxu1 %v3523_v57  ;;  %v265_v62 = vrot.slane %v264_v49, 4  ;;  %v3550_v57 = vld [vmem:[#allocation2 + $0x134] ss:$8 sps:$4 sm:$0xff]   ;;  %v3560_v49 = vld [vmem:[#allocation2 + $0x124] ss:$8 sps:$4 sm:$0xff]   ;;  %v435_v30 = vshll.u32 %v4156_v50, 16 }
  0x77   : > { %1538 = vmatprep.subr.bf16.mxu1 %v3529_v6  ;;  %1634 = vmatpush1.bf16.msra.mxu0 %v3540_v21  ;;  %v380_v6 = vsel %vm4032_vm5, %v375_v4, %v4196_v37  ;;  %v398_v21 = vor.u32 %v397_v38, %v394_v35  ;;  %v408_v39 = vor.u32 %v407_v63, %v4234_v47  ;;  %v3539_v37 = vld [vmem:[#allocation2 + $0x94] ss:$8 sps:$4 sm:$0xff]   ;;  %v429_v4 = vshrl.u32 %v4123_v11, 16  ;;  %v3558_v38 = vld [vmem:[#allocation2 + $0x120] ss:$8 sps:$4 sm:$0xff]  }
  0x78   : > { %1101 = vmatmul.mubr.bf16.gmra.mxu0 %v4165_v58  ;;  %v270_v2 = vsel %vm4032_vm5, %v265_v62, %v269_v46  ;;  %1635 = vmatprep.subr.bf16.mxu0 %v3550_v57  ;;  %v4262_v20 = vcombine.low %v380_v6, %v390_v17  ;;  %v421_v35 = vrot.slane %v419_v3, 5  ;;  %v3570_v62 = vld [vmem:[#allocation2 + $0x114] ss:$8 sps:$4 sm:$0xff]   ;;  %v3543_v57 = vld [vmem:[#allocation2 + $0x80] ss:$8 sps:$4 sm:$0xff]   ;;  %v443_v3 = vshll.u32 %v4172_v9, 16 }
  0x79   : > { %1254 = vmatmul.mubr.bf16.gmra.mxu1 %v4221_v26  ;;  %1110 = vmatprep.mubr.bf16.mxu0 %v4227_v53  ;;  %v431_v32 = vrot.slane %v429_v4, 4  ;;  %v3053_v40 = vcombine.low %v260_v24, %v270_v2  ;;  %v449_v17 = vshll.u32 %v4146_v43, 16  ;;  %v3551_v50 = vld [vmem:[#allocation2 + $0x4f0] ss:$8 sps:$4 sm:$0xff]   ;;  %v437_v2 = vrot.slane %v435_v30, 5 }
  0x7a   : > { %1539 = vmatpush2.bf16.msra.mxu1 %v3527_v31  ;;  %1263 = vmatprep.mubr.bf16.mxu1 %v3835_v0  ;;  %v4253_v31 = vcombine.low %v4042_v36, %v4029_v22  ;;  %v399_v22 = vrot.slane %v398_v21, 4  ;;  %v409_v36 = vrot.slane %v408_v39, 4  ;;  %v453_v21 = vshrl.u32 %v4146_v43, 16  ;;  %v3568_v39 = vld [vmem:[#allocation2 + $0x110] ss:$8 sps:$4 sm:$0xff]  }
  0x7b   : > { %1540 = vmatprep.subr.bf16.mxu1 %v3535_v25  ;;  %1636 = vmatpush1.bf16.msra.mxu0 %v3548_v29  ;;  %v418_v25 = vrot.slane %v416_v12, 4  ;;  %v432_v29 = vor.u32 %v431_v32, %v4264_v42  ;;  %v440_v12 = vshrl.u32 %v4172_v9, 16  ;;  %v3592_v32 = vld [vmem:[#allocation2 + $0x5f4] ss:$8 sps:$4 sm:$0xff]  }
  0x7c   : > { %1637 = vmatprep.subr.bf16.mxu0 %v3560_v49  ;;  %v404_v63 = vsel %vm4032_vm5, %v399_v22, %v4234_v47  ;;  %v414_v6 = vsel %vm4032_vm5, %v409_v36, %v413_v45  ;;  %v4282_v47 = vcombine.low %v4073_v5, %v4061_v56  ;;  %v3043_v49 = vcombine.low %v4188_v10, %v4193_v28  ;;  %v3580_v56 = vld [vmem:[#allocation2 + $0x104] ss:$8 sps:$4 sm:$0xff]   ;;  %v3578_v5 = vld [vmem:[#allocation2 + $0x100] ss:$8 sps:$4 sm:$0xff]  }
  0x7d   : > { %v422_v46 = vor.u32 %v421_v35, %v418_v25  ;;  %v4286_v34 = vcombine.low %v404_v63, %v414_v6  ;;  %v433_v24 = vrot.slane %v432_v29, 4  ;;  %v445_v45 = vrot.slane %v443_v3, 5  ;;  %v3554_v22 = vld [vmem:[#allocation2 + $0x4e0] ss:$8 sps:$4 sm:$0xff]  }
  0x7e   : > { %1541 = vmatpush2.bf16.msra.mxu1 %v3533_v59  ;;  %v3553_v59 = vld [vmem:[#allocation2 + $0x4f4] ss:$8 sps:$4 sm:$0xff]   ;;  %v451_v25 = vrot.slane %v449_v17, 5  ;;  %v455_v35 = vrot.slane %v453_v21, 4  ;;  %v4313_v3 = vcombine.low %v4120_v7, %v4123_v11  ;;  %v3571_v17 = vld [vmem:[#allocation2 + $0x4b0] ss:$8 sps:$4 sm:$0xff]   ;;  %v4324_v11 = vcombine.low %v4172_v9, %v4146_v43 }
  0x7f   : > { %1542 = vmatprep.subr.bf16.mxu1 %v3539_v37  ;;  %1638 = vmatpush1.bf16.msra.mxu0 %v3558_v38  ;;  %v3556_v37 = vld [vmem:[#allocation2 + $0x4e4] ss:$8 sps:$4 sm:$0xff]   ;;  %v423_v4 = vrot.slane %v422_v46, 4  ;;  %v3583_v7 = vld [vmem:[#allocation2 + $0x494] ss:$8 sps:$4 sm:$0xff]  }
  0x80   : > { %1111 = vmatmul.mubr.bf16.gmra.mxu0 %v4253_v31  ;;  %1639 = vmatprep.subr.bf16.mxu0 %v3570_v62  ;;  %v456_v46 = vor.u32 %v455_v35, %v451_v25  ;;  %v459_v62 = vshll.u32 %v4183_v1, 16  ;;  %v3564_v1 = vld [vmem:[#allocation2 + $0x4c0] ss:$8 sps:$4 sm:$0xff]   ;;  %v3595_v35 = vld [vmem:[#allocation2 + $0x564] ss:$8 sps:$4 sm:$0xff]  }
  0x81   : > { %1264 = vmatmul.mubr.bf16.gmra.mxu1 %v4255_v51  ;;  %1120 = vmatprep.mubr.bf16.mxu0 %v4262_v20  ;;  %v428_v36 = vsel %vm4032_vm5, %v423_v4, %v4264_v42  ;;  %v3561_v42 = vld [vmem:[#allocation2 + $0x4d0] ss:$8 sps:$4 sm:$0xff]  }
  0x82   : > { %1543 = vmatpush2.bf16.msra.mxu1 %v3537_v61  ;;  %1546 = vmatprep.mubr.bf16.mxu1 %v3053_v40  ;;  %v442_v61 = vrot.slane %v440_v12, 4  ;;  %v438_v40 = vsel %vm4032_vm5, %v433_v24, %v437_v2  ;;  %v457_v29 = vrot.slane %v456_v46, 4  ;;  %v461_v30 = vrot.slane %v459_v62, 5  ;;  %v3581_v4 = vld [vmem:[#allocation2 + $0x490] ss:$8 sps:$4 sm:$0xff]  }
  0x83   : > { %1544 = vmatprep.subr.bf16.mxu1 %v3545_v16  ;;  %1640 = vmatpush1.bf16.msra.mxu0 %v3568_v39  ;;  %v3563_v16 = vld [vmem:[#allocation2 + $0x4d4] ss:$8 sps:$4 sm:$0xff]   ;;  %v4301_v63 = vcombine.low %v428_v36, %v438_v40  ;;  %v3576_v39 = vld [vmem:[#allocation2 + $0x4a4] ss:$8 sps:$4 sm:$0xff]   ;;  %v3033_v24 = vrot.slane %v4188_v10, 9 }
  0x84   : > { %v446_v38 = vor.u32 %v445_v45, %v442_v61  ;;  %1641 = vmatprep.subr.bf16.mxu0 %v3580_v56  ;;  %v462_v12 = vsel %vm4032_vm5, %v457_v29, %v461_v30  ;;  %v3586_v61 = vld [vmem:[#allocation2 + $0x484] ss:$8 sps:$4 sm:$0xff]   ;;  %v3589_v10 = vld [vmem:[#allocation2 + $0x574] ss:$8 sps:$4 sm:$0xff]   ;;  %v3587_v45 = vld [vmem:[#allocation2 + $0x570] ss:$8 sps:$4 sm:$0xff]  }
  0x85   : > { %v3601_v56 = vld [vmem:[#allocation2 + $0x5e4] ss:$8 sps:$4 sm:$0xff]   ;;  %v3599_v36 = vld [vmem:[#allocation2 + $0x5e0] ss:$8 sps:$4 sm:$0xff]   ;;  %v3625_v30 = vld [vmem:[#allocation2 + $0x5b4] ss:$8 sps:$4 sm:$0xff]  }
  0x86   : > { %1545 = vmatpush2.bf16.msra.mxu1 %v3543_v57  ;;  %v4299_v57 = vcombine.low %v4092_v27, %v4084_v18  ;;  %v447_v6 = vrot.slane %v446_v38, 4  ;;  %v3573_v18 = vld [vmem:[#allocation2 + $0x4b4] ss:$8 sps:$4 sm:$0xff]   ;;  %v3604_v40 = vld [vmem:[#allocation2 + $0x544] ss:$8 sps:$4 sm:$0xff]  }
  0x87   : > { %2153 = vmatprep.subr.bf16.mxu1 %v3553_v59  ;;  %1642 = vmatpush1.bf16.msra.mxu0 %v3578_v5  ;;  %v3566_v59 = vld [vmem:[#allocation2 + $0x4c4] ss:$8 sps:$4 sm:$0xff]   ;;  %v3593_v5 = vld [vmem:[#allocation2 + $0x560] ss:$8 sps:$4 sm:$0xff]   ;;  %v3608_v38 = vld [vmem:[#allocation2 + $0x5d0] ss:$8 sps:$4 sm:$0xff]  }
  0x88   : > { %1121 = vmatmul.mubr.bf16.gmra.mxu0 %v4282_v47  ;;  %2266 = vmatprep.subr.bf16.mxu0 %v3592_v32  ;;  %v452_v27 = vsel %vm4032_vm5, %v447_v6, %v451_v25  ;;  %v3590_v25 = vld [vmem:[#allocation2 + $0x5f0] ss:$8 sps:$4 sm:$0xff]   ;;  %v3610_v32 = vld [vmem:[#allocation2 + $0x5d4] ss:$8 sps:$4 sm:$0xff]   ;;  %v3619_v46 = vld [vmem:[#allocation2 + $0x5c4] ss:$8 sps:$4 sm:$0xff]  }
  0x89   : > { %1547 = vmatmul.mubr.bf16.vlgmr.msra.gmra.mxu1 %v3043_v49  ;;  %1130 = vmatprep.mubr.bf16.mxu0 %v4286_v34  ;;  %v4315_v21 = vcombine.low %v452_v27, %v462_v12  ;;  %v3574_v49 = vld [vmem:[#allocation2 + $0x4a0] ss:$8 sps:$4 sm:$0xff]   ;;  %v3605_v6 = vld [vmem:[#allocation2 + $0x530] ss:$8 sps:$4 sm:$0xff]   ;;  %v3613_v29 = vld [vmem:[#allocation2 + $0x524] ss:$8 sps:$4 sm:$0xff]  }
  0x8a   : > { %2154 = vmatpush1.bf16.msra.mxu1 %v3551_v50  ;;  %1556 = vmatprep.mubr.bf16.mxu1 %v4058_v55  ;;  %v522_v50 = vrot.slane %v4193_v28, 5  ;;  %v3584_v28 = vld [vmem:[#allocation2 + $0x480] ss:$8 sps:$4 sm:$0xff]   ;;  %v3634_v27 = vld [vmem:[#allocation2 + $0x5a4] ss:$8 sps:$4 sm:$0xff]  }
  0x8b   : > { %2155 = vmatprep.subr.bf16.mxu1 %v3556_v37  ;;  %v525_v37 = vrot.slane %v4202_v41, 5  ;;  %v3602_v62 = vld [vmem:[#allocation2 + $0x540] ss:$8 sps:$4 sm:$0xff]   ;;  %v3616_v12 = vld [vmem:[#allocation2 + $0x514] ss:$8 sps:$4 sm:$0xff]  }
  0x8c   : > { %v524_v2 = vrot.slane %v522_v50, 4  ;;  %v523_v43 = vsel %vm3979_vm2, %v3033_v24, %v522_v50  ;;  %v3643_v50 = vld [vmem:[#allocation2 + $0x594] ss:$8 sps:$4 sm:$0xff]   ;;  %v3626_v24 = vld [vmem:[#allocation2 + $0x370] ss:$8 sps:$4 sm:$0xff]  }
  0x8e   : > { %2156 = vmatpush1.bf16.msra.mxu1 %v3554_v22  ;;  %v526_v9 = vsel %vm3979_vm2, %v524_v2, %v525_v37  ;;  %v3598_v22 = vld [vmem:[#allocation2 + $0x554] ss:$8 sps:$4 sm:$0xff]   ;;  %v3631_v2 = vld [vmem:[#allocation2 + $0x364] ss:$8 sps:$4 sm:$0xff]  }
  0x8f   : > { %2157 = vmatprep.subr.bf16.mxu1 %v3563_v16  ;;  %v3063_v41 = vcombine.low %v523_v43, %v526_v9  ;;  %v3596_v16 = vld [vmem:[#allocation2 + $0x550] ss:$8 sps:$4 sm:$0xff]   ;;  %v3628_v37 = vld [vmem:[#allocation2 + $0x374] ss:$8 sps:$4 sm:$0xff]   ;;  %v3629_v43 = vld [vmem:[#allocation2 + $0x360] ss:$8 sps:$4 sm:$0xff]  }
  0x90   : > { %1131 = vmatmul.mubr.bf16.gmra.mxu0 %v4299_v57  ;;  %v4354_v9 = vld [vmem:[#allocation2 + $0x474] ss:$8 sps:$4 sm:$0xff]  }
  0x91   : > { %1557 = vmatmul.mubr.bf16.gmra.mxu1 %v4128_v13  ;;  %1140 = vmatprep.mubr.bf16.mxu0 %v4301_v63 }
  0x92   : > { %2158 = vmatpush1.bf16.msra.mxu1 %v3561_v42  ;;  %1566 = vmatprep.mubr.bf16.mxu1 %v4134_v48  ;;  %v3607_v42 = vld [vmem:[#allocation2 + $0x534] ss:$8 sps:$4 sm:$0xff]  }
  0x93   : > { %2159 = vmatprep.subr.bf16.mxu1 %v3566_v59  ;;  %v3617_v59 = vld [vmem:[#allocation2 + $0x5c0] ss:$8 sps:$4 sm:$0xff]  }
  0x96   : > { %2160 = vmatpush1.bf16.msra.mxu1 %v3564_v1  ;;  %v3623_v1 = vld [vmem:[#allocation2 + $0x5b0] ss:$8 sps:$4 sm:$0xff]  }
  0x97   : > { %2161 = vmatprep.subr.bf16.mxu1 %v3573_v18  ;;  %v3611_v18 = vld [vmem:[#allocation2 + $0x520] ss:$8 sps:$4 sm:$0xff]  }
  0x98   : > { %1141 = vmatmul.mubr.bf16.gmra.mxu0 %v4313_v3 }
  0x99   : > { %1567 = vmatmul.mubr.bf16.gmra.mxu1 %v4161_v54  ;;  %1150 = vmatprep.mubr.bf16.mxu0 %v4315_v21 }
  0x9a   : > { %2162 = vmatpush1.bf16.msra.mxu1 %v3571_v17  ;;  %1576 = vmatprep.mubr.bf16.mxu1 %v4177_v8  ;;  %v3614_v17 = vld [vmem:[#allocation2 + $0x510] ss:$8 sps:$4 sm:$0xff]  }
  0x9b   : > { %2163 = vmatprep.subr.bf16.mxu1 %v3576_v39  ;;  %v3622_v39 = vld [vmem:[#allocation2 + $0x504] ss:$8 sps:$4 sm:$0xff]  }
  0x9e   : > { %2164 = vmatpush1.bf16.msra.mxu1 %v3574_v49  ;;  %v3632_v49 = vld [vmem:[#allocation2 + $0x5a0] ss:$8 sps:$4 sm:$0xff]  }
  0x9f   : > { %2165 = vmatprep.subr.bf16.mxu1 %v3583_v7  ;;  %v3620_v7 = vld [vmem:[#allocation2 + $0x500] ss:$8 sps:$4 sm:$0xff]  }
  0xa0   : > { %1151 = vmatmul.mubr.bf16.gmra.mxu0 %v4324_v11 }
  0xa1   : > { %1577 = vmatmul.mubr.bf16.gmra.mxu1 %v4165_v58  ;;  %1659 = vmatprep.mubr.bf16.mxu0 %v3835_v0 }
  0xa2   : > { %2166 = vmatpush1.bf16.msra.mxu1 %v3581_v4  ;;  %1586 = vmatprep.mubr.bf16.mxu1 %v4227_v53  ;;  %v3641_v4 = vld [vmem:[#allocation2 + $0x590] ss:$8 sps:$4 sm:$0xff]  }
  0xa3   : > { %2167 = vmatprep.subr.bf16.mxu1 %v3586_v61  ;;  %v3652_v61 = vld [vmem:[#allocation2 + $0x584] ss:$8 sps:$4 sm:$0xff]  }
  0xa6   : > { %2168 = vmatpush1.bf16.msra.mxu1 %v3584_v28  ;;  %v3650_v28 = vld [vmem:[#allocation2 + $0x580] ss:$8 sps:$4 sm:$0xff]  }
  0xa7   : > { %2169 = vmatprep.subr.bf16.mxu1 %v3589_v10  ;;  %v3637_v10 = vld [vmem:[#allocation2 + $0x354] ss:$8 sps:$4 sm:$0xff]  }
  0xa8   : > { %1660 = vmatmul.mubr.bf16.vlgmr.msra.gmra.mxu0 %v3063_v41  ;;  %v3635_v41 = vld [vmem:[#allocation2 + $0x350] ss:$8 sps:$4 sm:$0xff]  }
  0xa9   : > { %1587 = vmatmul.mubr.bf16.gmra.mxu1 %v4253_v31  ;;  %2267 = vmatpush1.bf16.msra.mxu0 %v3590_v25  ;;  %v3638_v25 = vld [vmem:[#allocation2 + $0x340] ss:$8 sps:$4 sm:$0xff]  }
  0xaa   : > { %2170 = vmatpush2.bf16.msra.mxu1 %v3587_v45  ;;  %1596 = vmatprep.mubr.bf16.mxu1 %v4262_v20  ;;  %v3640_v45 = vld [vmem:[#allocation2 + $0x344] ss:$8 sps:$4 sm:$0xff]  }
  0xab   : > { %2171 = vmatprep.subr.bf16.mxu1 %v3595_v35  ;;  %1669 = vmatprep.mubr.bf16.mxu0 %v3835_v0  ;;  %v3646_v35 = vld [vmem:[#allocation2 + $0x334] ss:$8 sps:$4 sm:$0xff]  }
  0xac   : > { %2268 = vmatprep.subr.bf16.mxu0 %v3601_v56  ;;  %v3644_v56 = vld [vmem:[#allocation2 + $0x330] ss:$8 sps:$4 sm:$0xff]  }
  0xad   : > { %2269 = vmatpush1.bf16.msra.mxu0 %v3599_v36  ;;  %v3655_v36 = vld [vmem:[#allocation2 + $0x314] ss:$8 sps:$4 sm:$0xff]  }
  0xae   : > { %2172 = vmatpush2.bf16.msra.mxu1 %v3593_v5  ;;  %2270 = vmatprep.subr.bf16.mxu0 %v3610_v32  ;;  %v3649_v5 = vld [vmem:[#allocation2 + $0x324] ss:$8 sps:$4 sm:$0xff]   ;;  %v3653_v32 = vld [vmem:[#allocation2 + $0x310] ss:$8 sps:$4 sm:$0xff]  }
  0xaf   : > { %2173 = vmatprep.subr.bf16.mxu1 %v3598_v22  ;;  %v3647_v22 = vld [vmem:[#allocation2 + $0x320] ss:$8 sps:$4 sm:$0xff]  }
  0xb0   : > { %1670 = vmatmul.mubr.bf16.gmra.mxu0 %v4001_v52 }
  0xb1   : > { %1597 = vmatmul.mubr.bf16.gmra.mxu1 %v4282_v47  ;;  %1679 = vmatprep.mubr.bf16.mxu0 %v3835_v0 }
  0xb2   : > { %2174 = vmatpush2.bf16.msra.mxu1 %v3596_v16  ;;  %1606 = vmatprep.mubr.bf16.mxu1 %v4286_v34  ;;  %v3658_v16 = vld [vmem:[#allocation2 + $0x304] ss:$8 sps:$4 sm:$0xff]  }
  0xb3   : > { %2175 = vmatprep.subr.bf16.mxu1 %v3604_v40  ;;  %2271 = vmatpush1.bf16.msra.mxu0 %v3608_v38  ;;  %v4367_v40 = vld [vmem:[%s3967_s8 + $0x6c] sm:$0xf]  ;;  %v4370_v38 = vld [vmem:[%s3967_s8 + $0x70] sm:$0xf] }
  0xb4   : > { %2272 = vmatprep.subr.bf16.mxu0 %v3619_v46  ;;  %v3656_v46 = vld [vmem:[#allocation2 + $0x300] ss:$8 sps:$4 sm:$0xff]  }
  0xb6   : > { %2176 = vmatpush2.bf16.msra.mxu1 %v3602_v62  ;;  %v3661_v62 = vld [vmem:[#allocation2 + $0x3f4] ss:$8 sps:$4 sm:$0xff]  }
  0xb7   : > { %2177 = vmatprep.subr.bf16.mxu1 %v3607_v42  ;;  %2273 = vmatpush1.bf16.msra.mxu0 %v3617_v59  ;;  %v464_v42 = vshrl.u32 %v4367_v40, 16  ;;  %v467_v59 = vshll.u32 %v4367_v40, 16 }
  0xb8   : > { %1680 = vmatmul.mubr.bf16.gmra.mxu0 %v4023_v14  ;;  %2274 = vmatprep.subr.bf16.mxu0 %v3625_v30  ;;  %v3659_v30 = vld [vmem:[#allocation2 + $0x3f0] ss:$8 sps:$4 sm:$0xff]  }
  0xb9   : > { %1607 = vmatmul.mubr.bf16.gmra.mxu1 %v4299_v57  ;;  %1689 = vmatprep.mubr.bf16.mxu0 %v3835_v0 }
  0xba   : > { %2178 = vmatpush2.bf16.msra.mxu1 %v3605_v6  ;;  %1616 = vmatprep.mubr.bf16.mxu1 %v4301_v63  ;;  %v473_v6 = vshll.u32 %v4370_v38, 16 }
  0xbb   : > { %2179 = vmatprep.subr.bf16.mxu1 %v3613_v29  ;;  %2275 = vmatpush1.bf16.msra.mxu0 %v3623_v1  ;;  %v477_v29 = vshrl.u32 %v4370_v38, 16  ;;  %v4380_v1 = vld [vmem:[#allocation2 + $0x470] ss:$8 sps:$4 sm:$0xff]  }
  0xbc   : > { %2276 = vmatprep.subr.bf16.mxu0 %v3634_v27  ;;  %v466_v27 = vrot.slane %v464_v42, 4  ;;  %v3685_v42 = vld [vmem:[#allocation2 + $0x3a4] ss:$8 sps:$4 sm:$0xff]  }
  0xbe   : > { %2180 = vmatpush2.bf16.msra.mxu1 %v3611_v18  ;;  %v3667_v18 = vld [vmem:[#allocation2 + $0x3e4] ss:$8 sps:$4 sm:$0xff]  }
  0xbf   : > { %2181 = vmatprep.subr.bf16.mxu1 %v3616_v12  ;;  %2277 = vmatpush1.bf16.msra.mxu0 %v3632_v49  ;;  %v469_v12 = vrot.slane %v467_v59, 5  ;;  %v4382_v49 = vld [vmem:[#allocation2 + $0x464] ss:$8 sps:$4 sm:$0xff]   ;;  %v4417_v59 = vld [vmem:[#allocation2 + $0x434] ss:$8 sps:$4 sm:$0xff]  }
  0xc0   : > { %1690 = vmatmul.mubr.bf16.gmra.mxu0 %v4052_v44  ;;  %2278 = vmatprep.subr.bf16.mxu0 %v3643_v50  ;;  %v4385_v50 = vld [vmem:[%s3967_s8 + $0x74] sm:$0x1]  ;;  %s3836_s8 = smov [#allocation5]  }
  0xc1   : > { %1617 = vmatmul.mubr.bf16.gmra.mxu1 %v4313_v3  ;;  %1699 = vmatprep.mubr.bf16.mxu0 %v3835_v0  ;;  %s3738_s10 = sshll.u32 %s3836_s8, 4  ;;  %s3739_s10 = int_to_ptr.vmem [resolvable:$false] %s3738_s10 }
  0xc2   : > { %2182 = vmatpush2.bf16.msra.mxu1 %v3614_v17  ;;  %2185 = vmatprep.mubr.bf16.mxu1 %v4134_v48  ;;  %v475_v17 = vrot.slane %v473_v6, 5  ;;  %v3683_v6 = vld [vmem:[#allocation2 + $0x3a0] ss:$8 sps:$4 sm:$0xff]   ;;  %s3740_s11 = scalar_lea.vmem %s3739_s10, 16384  ;;  %p3741_p2 = scmp.lt.s32.totalorder %s5153_s28, %s3739_s10 }
  0xc3   : > { %2183 = vmatprep.subr.bf16.mxu1 %v3622_v39  ;;  %2279 = vmatpush1.bf16.msra.mxu0 %v3641_v4  ;;  %v479_v39 = vrot.slane %v477_v29, 4  ;;  %v3670_v4 = vld [vmem:[#allocation2 + $0x3d4] ss:$8 sps:$4 sm:$0xff]   ;;  %v4423_v29 = vld [vmem:[#allocation2 + $0x424] ss:$8 sps:$4 sm:$0xff]   ;;  %p3742_p4 = scmp.lt.s32.totalorder %s3740_s11, %s3734_s7 }
  0xc4   : > { %2280 = vmatprep.subr.bf16.mxu0 %v3652_v61 }
  0xc5   : > { %v480_v61 = vor.u32 %v479_v39, %v475_v17  ;;  %v3704_v39 = vld [vmem:[#allocation2 + $0x414] ss:$8 sps:$4 sm:$0xff]   ;;  %p3743_p5 = por %p3742_p4, %p3741_p2 }
  0xc6   : > { %2184 = vmatpush2.bf16.msra.mxu1 %v3620_v7  ;;  %v3665_v7 = vld [vmem:[#allocation2 + $0x3e0] ss:$8 sps:$4 sm:$0xff]  }
  0xc7   : > { %2619 = vmatprep.subr.bf16.mxu1 %v3628_v37  ;;  %2281 = vmatpush1.bf16.msra.mxu0 %v3650_v28  ;;  %v4390_v37 = vld [vmem:[#allocation2 + $0x460] ss:$8 sps:$4 sm:$0xff]   ;;  %v483_v28 = vshll.u32 %v4385_v50, 16  ;;  %p3744_p6 = pnand %p3743_p5, %p3737_p1 }
  0xc8   : > { %1700 = vmatmul.mubr.bf16.gmra.mxu0 %v4086_v19  ;;  %2732 = vmatprep.subr.bf16.mxu0 %v4354_v9 }
  0xc9   : > { %2186 = vmatmul.mubr.bf16.vlgmr.msra.gmra.mxu1 %v4161_v54  ;;  %1709 = vmatprep.mubr.bf16.mxu0 %v3835_v0 }
  0xca   : > { %2620 = vmatpush1.bf16.msra.mxu1 %v3626_v24  ;;  %2195 = vmatprep.mubr.bf16.mxu1 %v4177_v8  ;;  %v4393_v24 = vld [vmem:[#allocation2 + $0x454] ss:$8 sps:$4 sm:$0xff]  }
  0xcb   : > { %2621 = vmatprep.subr.bf16.mxu1 %v3631_v2  ;;  %v470_v2 = vor.u32 %v469_v12, %v466_v27  ;;  %v3687_v27 = vld [vmem:[#allocation2 + $0x390] ss:$8 sps:$4 sm:$0xff]   ;;  %v3695_v12 = vld [vmem:[#allocation2 + $0x384] ss:$8 sps:$4 sm:$0xff]  }
  0xce   : > { %2622 = vmatpush1.bf16.msra.mxu1 %v3629_v43  ;;  %v3668_v43 = vld [vmem:[#allocation2 + $0x3d0] ss:$8 sps:$4 sm:$0xff]  }
  0xcf   : > { %2623 = vmatprep.subr.bf16.mxu1 %v3637_v10  ;;  %v3676_v10 = vld [vmem:[#allocation2 + $0x3c4] ss:$8 sps:$4 sm:$0xff]  }
  0xd0   : > { %1710 = vmatmul.mubr.bf16.gmra.mxu0 %v4130_v15 }
  0xd1   : > { %2196 = vmatmul.mubr.bf16.gmra.mxu1 %v4165_v58  ;;  %1719 = vmatprep.mubr.bf16.mxu0 %v3835_v0 }
  0xd2   : > { %2624 = vmatpush1.bf16.msra.mxu1 %v3635_v41  ;;  %2205 = vmatprep.mubr.bf16.mxu1 %v4227_v53  ;;  %v471_v41 = vrot.slane %v470_v2, 4  ;;  %v3707_v2 = vld [vmem:[#allocation2 + $0x404] ss:$8 sps:$4 sm:$0xff]  }
  0xd3   : > { %2625 = vmatprep.subr.bf16.mxu1 %v3640_v45  ;;  %v481_v45 = vrot.slane %v480_v61, 4 }
  0xd6   : > { %2626 = vmatpush1.bf16.msra.mxu1 %v3638_v25  ;;  %v485_v25 = vrot.slane %v483_v28, 5  ;;  %v3705_v28 = vld [vmem:[#allocation2 + $0x400] ss:$8 sps:$4 sm:$0xff]  }
  0xd7   : > { %2627 = vmatprep.subr.bf16.mxu1 %v3646_v35  ;;  %v4400_v35 = vld [vmem:[#allocation2 + $0x450] ss:$8 sps:$4 sm:$0xff]  }
  0xd8   : > { %1720 = vmatmul.mubr.bf16.gmra.mxu0 %v4168_v60 }
  0xd9   : > { %2206 = vmatmul.mubr.bf16.gmra.mxu1 %v4253_v31  ;;  %1729 = vmatprep.mubr.bf16.mxu0 %v3835_v0 }
  0xda   : > { %2628 = vmatpush1.bf16.msra.mxu1 %v3644_v56  ;;  %2215 = vmatprep.mubr.bf16.mxu1 %v4262_v20  ;;  %v4404_v56 = vld [vmem:[#allocation2 + $0x444] ss:$8 sps:$4 sm:$0xff]  }
  0xdb   : > { %2629 = vmatprep.subr.bf16.mxu1 %v3649_v5  ;;  %v3674_v5 = vld [vmem:[#allocation2 + $0x3c0] ss:$8 sps:$4 sm:$0xff]  }
  0xde   : > { %2630 = vmatpush1.bf16.msra.mxu1 %v3647_v22  ;;  %v3679_v22 = vld [vmem:[#allocation2 + $0x3b4] ss:$8 sps:$4 sm:$0xff]  }
  0xdf   : > { %2631 = vmatprep.subr.bf16.mxu1 %v3655_v36  ;;  %v476_v36 = vsel %vm4032_vm5, %v471_v41, %v475_v17  ;;  %v3699_v17 = vld [vmem:[#allocation2 + $0x420] ss:$8 sps:$4 sm:$0xff]  }
  0xe0   : > { %1730 = vmatmul.mubr.bf16.gmra.mxu0 %v4221_v26 }
  0xe1   : > { %2216 = vmatmul.mubr.bf16.gmra.mxu1 %v4282_v47  ;;  %2298 = vmatprep.mubr.bf16.mxu0 %v3835_v0 }
  0xe2   : > { %2632 = vmatpush1.bf16.msra.mxu1 %v3653_v32  ;;  %2225 = vmatprep.mubr.bf16.mxu1 %v4286_v34  ;;  %v486_v32 = vsel %vm4032_vm5, %v481_v45, %v485_v25 }
  0xe3   : > { %2633 = vmatprep.subr.bf16.mxu1 %v3658_v16  ;;  %v4413_v16 = vld [vmem:[#allocation2 + $0x440] ss:$8 sps:$4 sm:$0xff]  }
  0xe6   : > { %2634 = vmatpush1.bf16.msra.mxu1 %v3656_v46  ;;  %v3677_v46 = vld [vmem:[#allocation2 + $0x3b0] ss:$8 sps:$4 sm:$0xff]  }
  0xe7   : > { %2635 = vmatprep.subr.bf16.mxu1 %v3661_v62  ;;  %v3062_v62 = vcombine.low %v476_v36, %v486_v32 }
  0xe8   : > { %2299 = vmatmul.mubr.bf16.vlgmr.msra.gmra.mxu0 %v4023_v14 }
  0xe9   : > { %2226 = vmatmul.mubr.bf16.gmra.mxu1 %v4299_v57  ;;  %2733 = vmatpush1.bf16.msra.mxu0 %v4380_v1 }
  0xea   : > { %2636 = vmatpush2.bf16.msra.mxu1 %v3659_v30  ;;  %2235 = vmatprep.mubr.bf16.mxu1 %v4301_v63  ;;  %v3689_v30 = vld [vmem:[#allocation2 + $0x394] ss:$8 sps:$4 sm:$0xff]  }
  0xeb   : > { %2637 = vmatprep.subr.bf16.mxu1 %v3667_v18  ;;  %2308 = vmatprep.mubr.bf16.mxu0 %v3835_v0  ;;  %v3052_v18 = vcombine.low %v4367_v40, %v4370_v38 }
  0xec   : > { %2734 = vmatprep.subr.bf16.mxu0 %v4382_v49 }
  0xed   : > { %2735 = vmatpush1.bf16.msra.mxu0 %v4390_v37 }
  0xee   : > { %2638 = vmatpush2.bf16.msra.mxu1 %v3665_v7  ;;  %2736 = vmatprep.subr.bf16.mxu0 %v4393_v24  ;;  %v3693_v7 = vld [vmem:[#allocation2 + $0x380] ss:$8 sps:$4 sm:$0xff]  }
  0xef   : > { %2639 = vmatprep.subr.bf16.mxu1 %v3670_v4  ;;  %v3702_v4 = vld [vmem:[#allocation2 + $0x410] ss:$8 sps:$4 sm:$0xff]  }
  0xf0   : > { %2309 = vmatmul.mubr.bf16.gmra.mxu0 %v4052_v44 }
  0xf1   : > { %2236 = vmatmul.mubr.bf16.gmra.mxu1 %v4313_v3  ;;  %2318 = vmatprep.mubr.bf16.mxu0 %v3835_v0 }
  0xf2   : > { %2640 = vmatpush2.bf16.msra.mxu1 %v3668_v43  ;;  %2245 = vmatprep.mubr.bf16.mxu1 %v4315_v21 }
  0xf3   : > { %2641 = vmatprep.subr.bf16.mxu1 %v3676_v10  ;;  %2737 = vmatpush1.bf16.msra.mxu0 %v4400_v35  ;;  %v588_v10 = vrot.slane %v4385_v50, 5 }
  0xf4   : > { %2738 = vmatprep.subr.bf16.mxu0 %v4404_v56 }
  0xf6   : > { %2642 = vmatpush2.bf16.msra.mxu1 %v3674_v5 }
  0xf7   : > { %2643 = vmatprep.subr.bf16.mxu1 %v3679_v22  ;;  %2739 = vmatpush1.bf16.msra.mxu0 %v4413_v16 }
  0xf8   : > { %2319 = vmatmul.mubr.bf16.gmra.mxu0 %v4086_v19  ;;  %2740 = vmatprep.subr.bf16.mxu0 %v4417_v59 }
  0xf9   : > { %2246 = vmatmul.mubr.bf16.gmra.mxu1 %v4324_v11  ;;  %2328 = vmatprep.mubr.bf16.mxu0 %v3835_v0 }
  0xfa   : > { %2644 = vmatpush2.bf16.msra.mxu1 %v3677_v46  ;;  %2255 = vmatprep.mubr.bf16.mxu1 %v3062_v62 }
  0xfb   : > { %2645 = vmatprep.subr.bf16.mxu1 %v3685_v42  ;;  %2741 = vmatpush1.bf16.msra.mxu0 %v4421_v23 }
  0xfc   : > { %2742 = vmatprep.subr.bf16.mxu0 %v4423_v29 }
  0xfe   : > { %2646 = vmatpush2.bf16.msra.mxu1 %v3683_v6 }
  0xff   : > { %2647 = vmatprep.subr.bf16.mxu1 %v3689_v30  ;;  %2743 = vmatpush1.bf16.msra.mxu0 %v3699_v17 }
 0x100   : > { %2329 = vmatmul.mubr.bf16.gmra.mxu0 %v4130_v15  ;;  %2744 = vmatprep.subr.bf16.mxu0 %v3704_v39 }
 0x101   : > { %2256 = vmatmul.mubr.bf16.gmra.mxu1 %v3052_v18  ;;  %2338 = vmatprep.mubr.bf16.mxu0 %v3835_v0 }
 0x102   : > { %2648 = vmatpush2.bf16.msra.mxu1 %v3687_v27  ;;  %2651 = vmatprep.mubr.bf16.mxu1 %v4058_v55 }
 0x103   : > { %2649 = vmatprep.subr.bf16.mxu1 %v3695_v12  ;;  %2745 = vmatpush1.bf16.msra.mxu0 %v3702_v4 }
 0x104   : > { %2746 = vmatprep.subr.bf16.mxu0 %v3707_v2 }
 0x106   : > { %2650 = vmatpush2.bf16.msra.mxu1 %v3693_v7 }
 0x107   : > { %3305 = vmatprep.subr.bf16.mxu1 %v4354_v9  ;;  %2747 = vmatpush1.bf16.msra.mxu0 %v3705_v28 }
 0x108   : > { %2339 = vmatmul.mubr.bf16.gmra.mxu0 %v4168_v60 }
 0x109   : > { %v4435_v61 = vpop.f32.mrf.mxu1  ;;  %2652 = vmatmul.mubr.bf16.vlgmr.msra.gmra.mxu1 %v4128_v13  ;;  %2348 = vmatprep.mubr.bf16.mxu0 %v3835_v0 }
 0x10a   : > { %3313 = vmatpush1.bf16.msra.mxu1 %v4380_v1  ;;  %2661 = vmatprep.mubr.bf16.mxu1 %v4134_v48  ;;  %v585_v48 = vrot.slane %v4370_v38, 5 }
 0x10b   : > { %v4441_v55 = vpop.f32.mrf.mxu1  ;;  %3306 = vmatprep.subr.bf16.mxu1 %v4382_v49 }
 0x10d   : > { %v4445_v9 = vpop.f32.mrf.mxu1 }
 0x10e   : > { %3314 = vmatpush1.bf16.msra.mxu1 %v4390_v37  ;;  %v3042_v37 = vrot.slane %v4367_v40, 9 }
 0x10f   : > { %v4448_v43 = vpop.f32.mrf.mxu1  ;;  %3307 = vmatprep.subr.bf16.mxu1 %v4393_v24  ;;  %v587_v24 = vrot.slane %v585_v48, 4 }
 0x110   : > { %2349 = vmatmul.mubr.bf16.gmra.mxu0 %v4221_v26  ;;  %v586_v40 = vsel %vm3979_vm2, %v3042_v37, %v585_v48 }
 0x111   : > { %v4451_v13 = vpop.f32.mrf.mxu1  ;;  %2662 = vmatmul.mubr.bf16.gmra.mxu1 %v4161_v54  ;;  %2358 = vmatprep.mubr.bf16.mxu0 %v3835_v0  ;;  %v589_v38 = vsel %vm3979_vm2, %v587_v24, %v588_v10 }
 0x112   : > { %2671 = vmatprep.mubr.bf16.mxu1 %v4177_v8  ;;  %3315 = vmatpush1.bf16.msra.mxu1 %v4400_v35  ;;  %v3072_v45 = vcombine.low %v586_v40, %v589_v38 }
 0x113   : > { %v4458_v1 = vpop.f32.mrf.mxu1  ;;  %3308 = vmatprep.subr.bf16.mxu1 %v4404_v56 }
 0x115   : > { %v4462_v49 = vpop.f32.mrf.mxu1 }
 0x116   : > { %3316 = vmatpush1.bf16.msra.mxu1 %v4413_v16 }
 0x117   : > { %v4466_v54 = vpop.f32.mrf.mxu1  ;;  %3309 = vmatprep.subr.bf16.mxu1 %v4417_v59 }
 0x118   : > { %2359 = vmatmul.mubr.bf16.gmra.mxu0 %v4255_v51 }
 0x119   : > { %v4470_v8 = vpop.f32.mrf.mxu1  ;;  %2672 = vmatmul.mubr.bf16.gmra.mxu1 %v4165_v58  ;;  %2368 = vmatprep.mubr.bf16.mxu0 %v3835_v0 }
 0x11a   : > { %2681 = vmatprep.mubr.bf16.mxu1 %v4227_v53  ;;  %3317 = vmatpush1.bf16.msra.mxu1 %v4421_v23 }
 0x11b   : > { %v4480_v50 = vpop.f32.mrf.mxu1  ;;  %3310 = vmatprep.subr.bf16.mxu1 %v4423_v29 }
 0x11d   : > { %v4484_v41 = vpop.f32.mrf.mxu1 }
 0x11e   : > { %3318 = vmatpush1.bf16.msra.mxu1 %v3699_v17 }
 0x11f   : > { %v4486_v58 = vpop.f32.mrf.mxu1  ;;  %3311 = vmatprep.subr.bf16.mxu1 %v3704_v39 }
 0x120   : > { %2369 = vmatmul.mubr.bf16.gmra.mxu0 %v3072_v45 }
 0x121   : > { %v4488_v53 = vpop.f32.mrf.mxu1  ;;  %2682 = vmatmul.mubr.bf16.gmra.mxu1 %v4253_v31  ;;  %2764 = vmatprep.mubr.bf16.mxu0 %v3835_v0 }
 0x122   : > { %2691 = vmatprep.mubr.bf16.mxu1 %v4262_v20  ;;  %3319 = vmatpush1.bf16.msra.mxu1 %v3702_v4 }
 0x123   : > { %v4493_v33 = vpop.f32.mrf.mxu1  ;;  %3312 = vmatprep.subr.bf16.mxu1 %v3707_v2 }
 0x125   : > { %v4495_v25 = vpop.f32.mrf.mxu1 }
 0x126   : > { %3320 = vmatpush1.bf16.msra.mxu1 %v3705_v28 }
 0x127   : > { %v4497_v35 = vpop.f32.mrf.mxu1 }
 0x128   : > { %v4499_v56 = vpop.f32.mrf.mxu0  ;;  %2765 = vmatmul.mubr.bf16.vlgmr.msra.gmra.mxu0 %v4001_v52 }
 0x129   : > { %v4501_v5 = vpop.f32.mrf.mxu1  ;;  %2692 = vmatmul.mubr.bf16.gmra.mxu1 %v4282_v47  ;;  %2774 = vmatprep.mubr.bf16.mxu0 %v3835_v0 }
 0x12a   : > { %2701 = vmatprep.mubr.bf16.mxu1 %v4286_v34  ;;  %v4507_v31 = vpop.f32.mrf.mxu0 }
 0x12b   : > { %v4509_v20 = vpop.f32.mrf.mxu1 }
 0x12c   : > { %5227 = vst [vmem:[#allocation8_spill] sm:$0xff] %v4509_v20  ;;  %v4511_v22 = vpop.f32.mrf.mxu0 }
 0x12d   : > { %v4513_v36 = vpop.f32.mrf.mxu1 }
 0x12e   : > { %5228 = vst [vmem:[#allocation9_spill] sm:$0xff] %v4513_v36  ;;  %v4515_v32 = vpop.f32.mrf.mxu0 }
 0x12f   : > { %v4517_v16 = vpop.f32.mrf.mxu1 }
 0x130   : > { %5229 = vst [vmem:[#allocation10_spill] sm:$0xff] %v4517_v16  ;;  %v4519_v46 = vpop.f32.mrf.mxu0  ;;  %2775 = vmatmul.mubr.bf16.gmra.mxu0 %v4023_v14 }
 0x131   : > { %v4521_v47 = vpop.f32.mrf.mxu1  ;;  %2702 = vmatmul.mubr.bf16.gmra.mxu1 %v4299_v57  ;;  %2784 = vmatprep.mubr.bf16.mxu0 %v3835_v0 }
 0x132   : > { %5230 = vst [vmem:[#allocation11_spill] sm:$0xff] %v4521_v47  ;;  %2711 = vmatprep.mubr.bf16.mxu1 %v4301_v63  ;;  %v4527_v52 = vpop.f32.mrf.mxu0 }
 0x133   : > { %v4529_v34 = vpop.f32.mrf.mxu1 }
 0x134   : > { %5231 = vst [vmem:[#allocation12_spill] sm:$0xff] %v4529_v34  ;;  %v4531_v62 = vpop.f32.mrf.mxu0 }
 0x135   : > { %v4533_v42 = vpop.f32.mrf.mxu1 }
 0x136   : > { %5232 = vst [vmem:[#allocation13_spill] sm:$0xff] %v4533_v42  ;;  %v4535_v59 = vpop.f32.mrf.mxu0 }
 0x137   : > { %v4537_v23 = vpop.f32.mrf.mxu1 }
 0x138   : > { %5233 = vst [vmem:[#allocation14_spill] sm:$0xff] %v4537_v23  ;;  %v4539_v6 = vpop.f32.mrf.mxu0  ;;  %2785 = vmatmul.mubr.bf16.gmra.mxu0 %v4052_v44 }
 0x139   : > { %v4541_v57 = vpop.f32.mrf.mxu1  ;;  %2712 = vmatmul.mubr.bf16.gmra.mxu1 %v4313_v3  ;;  %2794 = vmatprep.mubr.bf16.mxu0 %v3835_v0 }
 0x13a   : > { %5234 = vst [vmem:[#allocation15_spill] sm:$0xff] %v4541_v57  ;;  %2721 = vmatprep.mubr.bf16.mxu1 %v4315_v21  ;;  %v4547_v14 = vpop.f32.mrf.mxu0 }
 0x13b   : > { %v4549_v63 = vpop.f32.mrf.mxu1 }
 0x13c   : > { %5235 = vst [vmem:[#allocation16_spill] sm:$0xff] %v4549_v63  ;;  %v4551_v29 = vpop.f32.mrf.mxu0 }
 0x13d   : > { %v4553_v30 = vpop.f32.mrf.mxu1 }
 0x13e   : > { %5236 = vst [vmem:[#allocation17_spill] sm:$0xff] %v4553_v30  ;;  %v4555_v18 = vpop.f32.mrf.mxu0 }
 0x13f   : > { %v4557_v27 = vpop.f32.mrf.mxu1 }
 0x140   : > { %5237 = vst [vmem:[#allocation18_spill] sm:$0xff] %v4557_v27  ;;  %v4559_v12 = vpop.f32.mrf.mxu0  ;;  %2795 = vmatmul.mubr.bf16.gmra.mxu0 %v4086_v19 }
 0x141   : > { %v4561_v3 = vpop.f32.mrf.mxu1  ;;  %2722 = vmatmul.mubr.bf16.gmra.mxu1 %v4324_v11  ;;  %2804 = vmatprep.mubr.bf16.mxu0 %v3835_v0 }
 0x142   : > { %5238 = vst [vmem:[#allocation19_spill] sm:$0xff] %v4561_v3  ;;  %2824 = vmatprep.mubr.bf16.mxu1 %v3835_v0  ;;  %v4567_v44 = vpop.f32.mrf.mxu0 }
 0x143   : > { %v4569_v21 = vpop.f32.mrf.mxu1 }
 0x144   : > { %5239 = vst [vmem:[#allocation20_spill] sm:$0xff] %v4569_v21  ;;  %v4571_v17 = vpop.f32.mrf.mxu0 }
 0x145   : > { %v4573_v39 = vpop.f32.mrf.mxu1 }
 0x146   : > { %5240 = vst [vmem:[#allocation21_spill] sm:$0xff] %v4573_v39  ;;  %v4575_v7 = vpop.f32.mrf.mxu0 }
 0x147   : > { %v4577_v4 = vpop.f32.mrf.mxu1 }
 0x148   : > { %5241 = vst [vmem:[#allocation22_spill] sm:$0xff] %v4577_v4  ;;  %v4579_v2 = vpop.f32.mrf.mxu0  ;;  %2805 = vmatmul.mubr.bf16.gmra.mxu0 %v4130_v15 }
 0x149   : > { %v1548_v11 = vpop.f32.mrf.mxu1  ;;  %2825 = vmatmul.mubr.bf16.vlgmr.msra.gmra.mxu1 %v4221_v26  ;;  %2814 = vmatprep.mubr.bf16.mxu0 %v3835_v0 }
 0x14a   : > { %2834 = vmatprep.mubr.bf16.mxu1 %v3835_v0  ;;  %v4585_v19 = vpop.f32.mrf.mxu0 }
 0x14b   : > { %v1550_v28 = vpop.f32.mrf.mxu1 }
 0x14c   : > { %v4587_v48 = vpop.f32.mrf.mxu0 }
 0x14d   : > { %5242 = vst [vmem:[#allocation23_spill] sm:$0xff] %v4587_v48  ;;  %v1552_v37 = vpop.f32.mrf.mxu1  ;;  %v1200_v48 = vadd.f32 %v4445_v9, %v4511_v22  ;;  %v1206_v9 = vadd.f32 %v4451_v13, %v4519_v46 }
 0x14e   : > { %v4589_v24 = vpop.f32.mrf.mxu0 }
 0x14f   : > { %5243 = vst [vmem:[#allocation24_spill] sm:$0xff] %v4589_v24  ;;  %v1554_v10 = vpop.f32.mrf.mxu1 }
 0x150   : > { %v4591_v40 = vpop.f32.mrf.mxu0  ;;  %2815 = vmatmul.mubr.bf16.gmra.mxu0 %v4168_v60 }
 0x151   : > { %5244 = vst [vmem:[#allocation25_spill] sm:$0xff] %v4591_v40  ;;  %v1558_v38 = vpop.f32.mrf.mxu1  ;;  %2835 = vmatmul.mubr.bf16.gmra.mxu1 %v4255_v51  ;;  %v1741_v51 = vlaneseq }
 0x152   : > { %v4595_v15 = vpop.f32.mrf.mxu0 }
 0x153   : > { %5245 = vst [vmem:[#allocation26_spill] sm:$0xff] %v4595_v15  ;;  %v1560_v26 = vpop.f32.mrf.mxu1 }
 0x154   : > { %v4597_v0 = vpop.f32.mrf.mxu0 }
 0x155   : > { %5246 = vst [vmem:[#allocation27_spill] sm:$0xff] %v4597_v0  ;;  %v4599_v45 = vpop.f32.mrf.mxu1 }
 0x156   : > { %v4601_v4 = vpop.f32.mrf.mxu0 }
 0x157   : > { %5247 = vst [vmem:[#allocation28_spill] sm:$0xff] %v4601_v4  ;;  %v4603_v39 = vpop.f32.mrf.mxu1  ;;  %v1742_v4 = vshrl.u32 %v1741_v51, 7  ;;  %v1196_v51 = vadd.f32 %v4435_v61, %v4499_v56 }
 0x158   : > { %v4605_v21 = vpop.f32.mrf.mxu0 }
 0x159   : > { %5248 = vst [vmem:[#allocation29_spill] sm:$0xff] %v4605_v21  ;;  %v4607_v3 = vpop.f32.mrf.mxu1  ;;  %v1743_v34 = vsub.s32 0, %v1742_v4  ;;  %v1549_v16 = vadd.f32 %v1548_v11, %v1196_v51 }
 0x15a   : > { %v4609_v27 = vpop.f32.mrf.mxu0 }
 0x15b   : > { %5249 = vst [vmem:[#allocation30_spill] sm:$0xff] %v4609_v27  ;;  %v4611_v60 = vpop.f32.mrf.mxu1 }
 0x15c   : > { %v4613_v30 = vpop.f32.mrf.mxu0 }
 0x15d   : > { %5250 = vst [vmem:[#allocation31_spill] sm:$0xff] %v4613_v30  ;;  %v4615_v63 = vpop.f32.mrf.mxu1 }
 0x15e   : > { %v4617_v57 = vpop.f32.mrf.mxu0 }
 0x15f   : > { %5251 = vst [vmem:[#allocation32_spill] sm:$0xff] %v4617_v57  ;;  %v4619_v23 = vpop.f32.mrf.mxu1  ;;  %v710_v57 = vld [vmem:[%s5216_s2] sm:$0x3] }
 0x160   : > { %v4621_v42 = vpop.f32.mrf.mxu0 }
 0x161   : > { %5252 = vst [vmem:[#allocation33_spill] sm:$0xff] %v4621_v42  ;;  %v4623_v21 = vpop.f32.mrf.mxu1  ;;  %v1747_v42 = vsub.s32 1, %v1742_v4 }
 0x162   : > { %v4625_v0 = vpop.f32.mrf.mxu0 }
 0x163   : > { %5253 = vst [vmem:[#allocation34_spill] sm:$0xff] %v4625_v0  ;;  %v4627_v27 = vpop.f32.mrf.mxu1  ;;  %v1198_v0 = vadd.f32 %v4441_v55, %v4507_v31  ;;  %v4653_v4 = vrot.slane %v710_v57, %v1747_v42  ;;  %v1202_v55 = vadd.f32 %v4448_v43, %v4515_v32  ;;  %v1553_v31 = vadd.f32 %v1552_v37, %v1200_v48 }
 0x164   : > { %v4629_v15 = vpop.f32.mrf.mxu0  ;;  %v1559_v42 = vadd.f32 %v1558_v38, %v1206_v9  ;;  %v1210_v48 = vadd.f32 %v4462_v49, %v4531_v62 }
 0x165   : > { %5254 = vst [vmem:[#allocation35_spill] sm:$0xff] %v4629_v15  ;;  %v4631_v30 = vpop.f32.mrf.mxu1  ;;  %v4647_v15 = vrot.slane %v710_v57, %v1743_v34  ;;  %v1551_v61 = vadd.f32 %v1550_v28, %v1198_v0  ;;  %v1555_v22 = vadd.f32 %v1554_v10, %v1202_v55 }
 0x166   : > { %v4639_v47 = vpop.f32.mrf.mxu0  ;;  %v1563_v38 = vadd.f32 %v4599_v45, %v1210_v48  ;;  %v1228_v48 = vadd.f32 %v4493_v33, %v4567_v44 }
 0x167   : > { %5255 = vst [vmem:[#allocation36_spill] sm:$0xff] %v4639_v47  ;;  %v4641_v40 = vpop.f32.mrf.mxu1 }
 0x168   : > { %v1661_v36 = vpop.f32.mrf.mxu0 }
 0x169   : > { %v4649_v24 = vpop.f32.mrf.mxu1  ;;  %v1662_v56 = vadd.f32 %v1661_v36, %v1549_v16 }
 0x16a   : > { %5256 = vst [vmem:[#allocation37_spill] sm:$0xff] %v4649_v24  ;;  %v1663_v20 = vpop.f32.mrf.mxu0 }
 0x16b   : > { %v4655_v47 = vpop.f32.mrf.mxu1  ;;  %v1751_v34 = vadd.f32 %v4647_v15, %v1662_v56  ;;  %v1664_v11 = vadd.f32 %v1663_v20, %v1551_v61  ;;  %v1208_v20 = vadd.f32 %v4458_v1, %v4527_v52  ;;  %v1212_v52 = vadd.f32 %v4466_v54, %v4535_v59 }
 0x16c   : > { %v1665_v24 = vpop.f32.mrf.mxu0 }
 0x16d   : > { %v4660_v51 = vpop.f32.mrf.mxu1  ;;  %1783 = vst [vmem:[%s4664_s21] sm:$0xff] %v1751_v34  ;;  %v1752_v36 = vadd.f32 %v4653_v4, %v1664_v11  ;;  %v1666_v43 = vadd.f32 %v1665_v24, %v1553_v31  ;;  %v1561_v37 = vadd.f32 %v1560_v26, %v1208_v20  ;;  %v1216_v26 = vadd.f32 %v4470_v8, %v4539_v6 }
 0x16e   : > { %v1667_v16 = vpop.f32.mrf.mxu0  ;;  %v1565_v55 = vadd.f32 %v4603_v39, %v1212_v52  ;;  %v1218_v34 = vadd.f32 %v4480_v50, %v4547_v14 }
 0x16f   : > { %v4668_v32 = vpop.f32.mrf.mxu1  ;;  %1784 = vst [vmem:[%s4664_s21 + $0x8] sm:$0xff] %v1752_v36  ;;  %v1753_v13 = vadd.f32 %v4647_v15, %v1666_v43  ;;  %v1668_v46 = vadd.f32 %v1667_v16, %v1555_v22  ;;  %v1569_v11 = vadd.f32 %v4607_v3, %v1216_v26  ;;  %v1220_v22 = vadd.f32 %v4484_v41, %v4551_v29 }
 0x170   : > { %v1671_v28 = vpop.f32.mrf.mxu0  ;;  %v1571_v36 = vadd.f32 %v4611_v60, %v1218_v34  ;;  %v1222_v16 = vadd.f32 %v4486_v58, %v4555_v18 }
 0x171   : > { %v4674_v57 = vpop.f32.mrf.mxu1  ;;  %1785 = vst [vmem:[%s4664_s21 + $0x10] sm:$0xff] %v1753_v13  ;;  %v1754_v24 = vadd.f32 %v4653_v4, %v1668_v46  ;;  %v1672_v10 = vadd.f32 %v1671_v28, %v1559_v42  ;;  %v1573_v20 = vadd.f32 %v4615_v63, %v1220_v22  ;;  %v1226_v13 = vadd.f32 %v4488_v53, %v4559_v12 }
 0x172   : > { %v1673_v1 = vpop.f32.mrf.mxu0  ;;  %v1575_v46 = vadd.f32 %v4619_v23, %v1222_v16  ;;  %v5262_v16 = vld [vmem:[#allocation10_spill] sm:$0xff] }
 0x173   : > { %v4680_v0 = vpop.f32.mrf.mxu1  ;;  %1786 = vst [vmem:[%s4664_s21 + $0x18] sm:$0xff] %v1754_v24  ;;  %v1755_v61 = vadd.f32 %v4647_v15, %v1672_v10  ;;  %v1674_v56 = vadd.f32 %v1673_v1, %v1561_v37  ;;  %v1579_v37 = vadd.f32 %v4623_v21, %v1226_v13  ;;  %v1230_v10 = vadd.f32 %v4495_v25, %v4571_v17 }
 0x174   : > { %v1675_v62 = vpop.f32.mrf.mxu0  ;;  %v1581_v1 = vadd.f32 %v4627_v27, %v1228_v48 }
 0x175   : > { %v4687_v49 = vpop.f32.mrf.mxu1  ;;  %1787 = vst [vmem:[%s4664_s21 + $0x40] sm:$0xff] %v1755_v61  ;;  %v1756_v31 = vadd.f32 %v4653_v4, %v1674_v56  ;;  %v1676_v54 = vadd.f32 %v1675_v62, %v1563_v38  ;;  %v1232_v38 = vadd.f32 %v4497_v35, %v4575_v7  ;;  %v1583_v61 = vadd.f32 %v4631_v30, %v1230_v10 }
 0x176   : > { %v1677_v45 = vpop.f32.mrf.mxu0  ;;  %v1236_v62 = vadd.f32 %v4501_v5, %v4579_v2 }
 0x177   : > { %v4694_v59 = vpop.f32.mrf.mxu1  ;;  %1788 = vst [vmem:[%s4664_s21 + $0x48] sm:$0xff] %v1756_v31  ;;  %v1757_v9 = vadd.f32 %v4647_v15, %v1676_v54  ;;  %v1678_v8 = vadd.f32 %v1677_v45, %v1565_v55  ;;  %v1585_v26 = vadd.f32 %v4641_v40, %v1232_v38  ;;  %v5257_v31 = vld [vmem:[#allocation8_spill] sm:$0xff]  ;;  %v5258_v45 = vld [vmem:[#allocation37_spill] sm:$0xff]  ;;  %v5259_v40 = vld [vmem:[#allocation23_spill] sm:$0xff] }
 0x178   : > { %v1681_v39 = vpop.f32.mrf.mxu0  ;;  %v1238_v54 = vadd.f32 %v5257_v31, %v4585_v19  ;;  %v1589_v34 = vadd.f32 %v5258_v45, %v1236_v62 }
 0x179   : > { %v4701_v6 = vpop.f32.mrf.mxu1  ;;  %1789 = vst [vmem:[%s4664_s21 + $0x50] sm:$0xff] %v1757_v9  ;;  %v1758_v43 = vadd.f32 %v4653_v4, %v1678_v8  ;;  %v1682_v50 = vadd.f32 %v1681_v39, %v1569_v11  ;;  %v5260_v8 = vld [vmem:[#allocation9_spill] sm:$0xff] }
 0x17a   : > { %v1683_v3 = vpop.f32.mrf.mxu0  ;;  %v1240_v39 = vadd.f32 %v5260_v8, %v5259_v40  ;;  %v1591_v22 = vadd.f32 %v4655_v47, %v1238_v54  ;;  %v5263_v47 = vld [vmem:[#allocation25_spill] sm:$0xff] }
 0x17b   : > { %v4708_v14 = vpop.f32.mrf.mxu1  ;;  %1790 = vst [vmem:[%s4664_s21 + $0x58] sm:$0xff] %v1758_v43  ;;  %v1759_v42 = vadd.f32 %v4647_v15, %v1682_v50  ;;  %v1684_v41 = vadd.f32 %v1683_v3, %v1571_v36  ;;  %v5261_v3 = vld [vmem:[#allocation24_spill] sm:$0xff] }
 0x17c   : > { %v1685_v60 = vpop.f32.mrf.mxu0 }
 0x17d   : > { %v4715_v29 = vpop.f32.mrf.mxu1  ;;  %1791 = vst [vmem:[%s4664_s21 + $0x80] sm:$0xff] %v1759_v42  ;;  %v1760_v28 = vadd.f32 %v4653_v4, %v1684_v41  ;;  %v1686_v58 = vadd.f32 %v1685_v60, %v1573_v20  ;;  %v1242_v20 = vadd.f32 %v5262_v16, %v5261_v3  ;;  %v1593_v42 = vadd.f32 %v4660_v51, %v1240_v39  ;;  %v5265_v51 = vld [vmem:[#allocation26_spill] sm:$0xff] }
 0x17e   : > { %v1687_v63 = vpop.f32.mrf.mxu0 }
 0x17f   : > { %v4722_v18 = vpop.f32.mrf.mxu1  ;;  %1792 = vst [vmem:[%s4664_s21 + $0x88] sm:$0xff] %v1760_v28  ;;  %v1761_v24 = vadd.f32 %v4647_v15, %v1686_v58  ;;  %v1688_v53 = vadd.f32 %v1687_v63, %v1575_v46  ;;  %v5264_v28 = vld [vmem:[#allocation11_spill] sm:$0xff]  ;;  %v1595_v63 = vadd.f32 %v4668_v32, %v1242_v20 }
 0x180   : > { %v1691_v23 = vpop.f32.mrf.mxu0  ;;  %v1246_v58 = vadd.f32 %v5264_v28, %v5263_v47  ;;  %v5267_v32 = vld [vmem:[#allocation27_spill] sm:$0xff] }
 0x181   : > { %v4729_v12 = vpop.f32.mrf.mxu1  ;;  %1793 = vst [vmem:[%s4664_s21 + $0x90] sm:$0xff] %v1761_v24  ;;  %v1762_v52 = vadd.f32 %v4653_v4, %v1688_v53  ;;  %v1692_v33 = vadd.f32 %v1691_v23, %v1579_v37  ;;  %v5266_v23 = vld [vmem:[#allocation12_spill] sm:$0xff] }
 0x182   : > { %v1693_v21 = vpop.f32.mrf.mxu0  ;;  %v1248_v10 = vadd.f32 %v5266_v23, %v5265_v51 }
 0x183   : > { %v4736_v44 = vpop.f32.mrf.mxu1  ;;  %1794 = vst [vmem:[%s4664_s21 + $0x98] sm:$0xff] %v1762_v52  ;;  %v1763_v56 = vadd.f32 %v4647_v15, %v1692_v33  ;;  %v1694_v25 = vadd.f32 %v1693_v21, %v1581_v1  ;;  %v1599_v1 = vadd.f32 %v4674_v57, %v1246_v58  ;;  %v5269_v57 = vld [vmem:[#allocation28_spill] sm:$0xff] }
 0x184   : > { %v1695_v27 = vpop.f32.mrf.mxu0 }
 0x185   : > { %v4743_v17 = vpop.f32.mrf.mxu1  ;;  %1795 = vst [vmem:[%s4664_s21 + $0xc0] sm:$0xff] %v1763_v56  ;;  %v1764_v55 = vadd.f32 %v4653_v4, %v1694_v25  ;;  %v1696_v35 = vadd.f32 %v1695_v27, %v1583_v61  ;;  %v5268_v61 = vld [vmem:[#allocation13_spill] sm:$0xff]  ;;  %v1601_v25 = vadd.f32 %v4680_v0, %v1248_v10 }
 0x186   : > { %v1697_v30 = vpop.f32.mrf.mxu0  ;;  %v1250_v56 = vadd.f32 %v5268_v61, %v5267_v32  ;;  %v5271_v0 = vld [vmem:[#allocation29_spill] sm:$0xff] }
 0x187   : > { %v4750_v7 = vpop.f32.mrf.mxu1  ;;  %1796 = vst [vmem:[%s4664_s21 + $0xc8] sm:$0xff] %v1764_v55  ;;  %v1765_v11 = vadd.f32 %v4647_v15, %v1696_v35  ;;  %v1698_v5 = vadd.f32 %v1697_v30, %v1585_v26  ;;  %v5270_v35 = vld [vmem:[#allocation14_spill] sm:$0xff] }
 0x188   : > { %v1701_v2 = vpop.f32.mrf.mxu0  ;;  %v1252_v30 = vadd.f32 %v5270_v35, %v5269_v57  ;;  %v1603_v31 = vadd.f32 %v4687_v49, %v1250_v56  ;;  %v5273_v49 = vld [vmem:[#allocation30_spill] sm:$0xff] }
 0x189   : > { %v4757_v9 = vpop.f32.mrf.mxu1  ;;  %1797 = vst [vmem:[%s4664_s21 + $0xd0] sm:$0xff] %v1765_v11  ;;  %v1766_v36 = vadd.f32 %v4653_v4, %v1698_v5  ;;  %v1702_v19 = vadd.f32 %v1701_v2, %v1589_v34  ;;  %v5272_v5 = vld [vmem:[#allocation15_spill] sm:$0xff] }
 0x18a   : > { %v1703_v43 = vpop.f32.mrf.mxu0  ;;  %v1256_v2 = vadd.f32 %v5272_v5, %v5271_v0  ;;  %v1605_v40 = vadd.f32 %v4694_v59, %v1252_v30  ;;  %v5275_v59 = vld [vmem:[#allocation31_spill] sm:$0xff] }
 0x18b   : > { %v4764_v50 = vpop.f32.mrf.mxu1  ;;  %1798 = vst [vmem:[%s4664_s21 + $0xd8] sm:$0xff] %v1766_v36  ;;  %v1767_v41 = vadd.f32 %v4647_v15, %v1702_v19  ;;  %v1704_v60 = vadd.f32 %v1703_v43, %v1591_v22  ;;  %v5274_v19 = vld [vmem:[#allocation16_spill] sm:$0xff] }
 0x18c   : > { %v1705_v13 = vpop.f32.mrf.mxu0  ;;  %v1258_v43 = vadd.f32 %v5274_v19, %v5273_v49  ;;  %v1609_v3 = vadd.f32 %v4701_v6, %v1256_v2  ;;  %v5277_v6 = vld [vmem:[#allocation32_spill] sm:$0xff] }
 0x18d   : > { %v4771_v46 = vpop.f32.mrf.mxu1  ;;  %1799 = vst [vmem:[%s4664_s21 + $0x100] sm:$0xff] %v1767_v41  ;;  %v1768_v48 = vadd.f32 %v4653_v4, %v1704_v60  ;;  %v1706_v37 = vadd.f32 %v1705_v13, %v1593_v42  ;;  %v5276_v60 = vld [vmem:[#allocation17_spill] sm:$0xff] }
 0x18e   : > { %v1707_v24 = vpop.f32.mrf.mxu0  ;;  %v1260_v13 = vadd.f32 %v5276_v60, %v5275_v59  ;;  %v1611_v47 = vadd.f32 %v4708_v14, %v1258_v43  ;;  %v5279_v14 = vld [vmem:[#allocation33_spill] sm:$0xff] }
 0x18f   : > { %v4778_v53 = vpop.f32.mrf.mxu1  ;;  %1800 = vst [vmem:[%s4664_s21 + $0x108] sm:$0xff] %v1768_v48  ;;  %v1769_v52 = vadd.f32 %v4647_v15, %v1706_v37  ;;  %v1708_v33 = vadd.f32 %v1707_v24, %v1595_v63  ;;  %v5278_v37 = vld [vmem:[#allocation18_spill] sm:$0xff] }
 0x190   : > { %v1711_v21 = vpop.f32.mrf.mxu0  ;;  %v1262_v24 = vadd.f32 %v5278_v37, %v5277_v6  ;;  %v1613_v51 = vadd.f32 %v4715_v29, %v1260_v13  ;;  %v5281_v29 = vld [vmem:[#allocation34_spill] sm:$0xff] }
 0x191   : > { %v4785_v38 = vpop.f32.mrf.mxu1  ;;  %1801 = vst [vmem:[%s4664_s21 + $0x110] sm:$0xff] %v1769_v52  ;;  %v1770_v27 = vadd.f32 %v4653_v4, %v1708_v33  ;;  %v1712_v62 = vadd.f32 %v1711_v21, %v1599_v1  ;;  %v5280_v33 = vld [vmem:[#allocation19_spill] sm:$0xff] }
 0x192   : > { %v1713_v26 = vpop.f32.mrf.mxu0  ;;  %v1266_v21 = vadd.f32 %v5280_v33, %v5279_v14  ;;  %v1615_v32 = vadd.f32 %v4722_v18, %v1262_v24  ;;  %v5283_v18 = vld [vmem:[#allocation35_spill] sm:$0xff] }
 0x193   : > { %v4792_v55 = vpop.f32.mrf.mxu1  ;;  %1802 = vst [vmem:[%s4664_s21 + $0x118] sm:$0xff] %v1770_v27  ;;  %v1771_v54 = vadd.f32 %v4647_v15, %v1712_v62  ;;  %v1714_v45 = vadd.f32 %v1713_v26, %v1601_v25  ;;  %v5282_v62 = vld [vmem:[#allocation20_spill] sm:$0xff] }
 0x194   : > { %v1715_v34 = vpop.f32.mrf.mxu0  ;;  %v1268_v26 = vadd.f32 %v5282_v62, %v5281_v29  ;;  %v1619_v57 = vadd.f32 %v4729_v12, %v1266_v21 }
 0x195   : > { %v4799_v11 = vpop.f32.mrf.mxu1  ;;  %1803 = vst [vmem:[%s4664_s21 + $0x140] sm:$0xff] %v1771_v54  ;;  %v1772_v8 = vadd.f32 %v4653_v4, %v1714_v45  ;;  %v1716_v39 = vadd.f32 %v1715_v34, %v1603_v31  ;;  %v5284_v45 = vld [vmem:[#allocation21_spill] sm:$0xff] }
 0x196   : > { %v1717_v22 = vpop.f32.mrf.mxu0  ;;  %v1270_v34 = vadd.f32 %v5284_v45, %v5283_v18  ;;  %v1621_v0 = vadd.f32 %v4736_v44, %v1268_v26 }
 0x197   : > { %v4806_v36 = vpop.f32.mrf.mxu1  ;;  %1804 = vst [vmem:[%s4664_s21 + $0x148] sm:$0xff] %v1772_v8  ;;  %v1773_v16 = vadd.f32 %v4647_v15, %v1716_v39  ;;  %v1718_v20 = vadd.f32 %v1717_v22, %v1605_v40  ;;  %v5285_v8 = vld [vmem:[#allocation36_spill] sm:$0xff]  ;;  %v5286_v39 = vld [vmem:[#allocation22_spill] sm:$0xff] }
 0x198   : > { %v1721_v42 = vpop.f32.mrf.mxu0  ;;  %v1272_v22 = vadd.f32 %v5286_v39, %v5285_v8  ;;  %v1623_v49 = vadd.f32 %v4743_v17, %v1270_v34 }
 0x199   : > { %v4813_v41 = vpop.f32.mrf.mxu1  ;;  %1805 = vst [vmem:[%s4664_s21 + $0x150] sm:$0xff] %v1773_v16  ;;  %v1774_v28 = vadd.f32 %v4653_v4, %v1718_v20  ;;  %v1722_v58 = vadd.f32 %v1721_v42, %v1609_v3 }
 0x19a   : > { %v1723_v63 = vpop.f32.mrf.mxu0  ;;  %v1625_v16 = vadd.f32 %v4750_v7, %v1272_v22 }
 0x19b   : > { %v4820_v48 = vpop.f32.mrf.mxu1  ;;  %1806 = vst [vmem:[%s4664_s21 + $0x158] sm:$0xff] %v1774_v28  ;;  %v1775_v23 = vadd.f32 %v4647_v15, %v1722_v58  ;;  %v1724_v10 = vadd.f32 %v1723_v63, %v1611_v47 }
 0x19c   : > { %v1725_v1 = vpop.f32.mrf.mxu0 }
 0x19d   : > { %v4827_v52 = vpop.f32.mrf.mxu1  ;;  %1807 = vst [vmem:[%s4664_s21 + $0x180] sm:$0xff] %v1775_v23  ;;  %v1776_v61 = vadd.f32 %v4653_v4, %v1724_v10  ;;  %v1726_v56 = vadd.f32 %v1725_v1, %v1613_v51 }
 0x19e   : > { %v1727_v25 = vpop.f32.mrf.mxu0 }
 0x19f   : > { %v4834_v27 = vpop.f32.mrf.mxu1  ;;  %1808 = vst [vmem:[%s4664_s21 + $0x188] sm:$0xff] %v1776_v61  ;;  %v1777_v35 = vadd.f32 %v4647_v15, %v1726_v56  ;;  %v1728_v30 = vadd.f32 %v1727_v25, %v1615_v32 }
 0x1a0   : > { %v1731_v31 = vpop.f32.mrf.mxu0 }
 0x1a1   : > { %v4841_v54 = vpop.f32.mrf.mxu1  ;;  %1809 = vst [vmem:[%s4664_s21 + $0x190] sm:$0xff] %v1777_v35  ;;  %v1778_v5 = vadd.f32 %v4653_v4, %v1728_v30  ;;  %v1732_v2 = vadd.f32 %v1731_v31, %v1619_v57 }
 0x1a2   : > { %v1733_v40 = vpop.f32.mrf.mxu0 }
 0x1a3   : > { %v4848_v12 = vpop.f32.mrf.mxu1  ;;  %1810 = vst [vmem:[%s4664_s21 + $0x198] sm:$0xff] %v1778_v5  ;;  %v1779_v19 = vadd.f32 %v4647_v15, %v1732_v2  ;;  %v1734_v43 = vadd.f32 %v1733_v40, %v1621_v0 }
 0x1a4   : > { %v1735_v3 = vpop.f32.mrf.mxu0 }
 0x1a5   : > { %v4855_v44 = vpop.f32.mrf.mxu1  ;;  %1811 = vst [vmem:[%s4664_s21 + $0x1c0] sm:$0xff] %v1779_v19  ;;  %v1780_v20 = vadd.f32 %v4653_v4, %v1734_v43  ;;  %v1736_v42 = vadd.f32 %v1735_v3, %v1623_v49 }
 0x1a6   : > { %v1737_v59 = vpop.f32.mrf.mxu0 }
 0x1a7   : > { %v4860_v60 = vpop.f32.mrf.mxu1  ;;  %1812 = vst [vmem:[%s4664_s21 + $0x1c8] sm:$0xff] %v1780_v20  ;;  %v1781_v17 = vadd.f32 %v4647_v15, %v1736_v42  ;;  %v1738_v13 = vadd.f32 %v1737_v59, %v1625_v16 }
 0x1a8   : > { %v4866_v28 = vpop.f32.mrf.mxu0 }
 0x1a9   : > { %v4864_v47 = vpop.f32.mrf.mxu1  ;;  %1813 = vst [vmem:[%s4664_s21 + $0x1d0] sm:$0xff] %v1781_v17  ;;  %v1782_v58 = vadd.f32 %v4653_v4, %v1738_v13 }
 0x1aa   : > { %v4872_v7 = vpop.f32.mrf.mxu0 }
 0x1ab   : > { %v4870_v63 = vpop.f32.mrf.mxu1  ;;  %1814 = vst [vmem:[%s4664_s21 + $0x1d8] sm:$0xff] %v1782_v58 }
 0x1ac   : > { %5287 = vst [vmem:[#allocation8_spill] sm:$0xff] %v4870_v63  ;;  %v4877_v37 = vpop.f32.mrf.mxu0 }
 0x1ad   : > { %v4875_v6 = vpop.f32.mrf.mxu1 }
 0x1ae   : > { %5288 = vst [vmem:[#allocation37_spill] sm:$0xff] %v4875_v6  ;;  %v4881_v51 = vpop.f32.mrf.mxu0 }
 0x1af   : > { %v4879_v24 = vpop.f32.mrf.mxu1 }
 0x1b0   : > { %5289 = vst [vmem:[#allocation23_spill] sm:$0xff] %v4879_v24  ;;  %v4885_v10 = vpop.f32.mrf.mxu0 }
 0x1b1   : > { %v4883_v23 = vpop.f32.mrf.mxu1 }
 0x1b2   : > { %5290 = vst [vmem:[#allocation9_spill] sm:$0xff] %v4883_v23  ;;  %v4889_v14 = vpop.f32.mrf.mxu0 }
 0x1b3   : > { %v4887_v1 = vpop.f32.mrf.mxu1 }
 0x1b4   : > { %5291 = vst [vmem:[#allocation24_spill] sm:$0xff] %v4887_v1  ;;  %v4893_v21 = vpop.f32.mrf.mxu0 }
 0x1b5   : > { %v4891_v33 = vpop.f32.mrf.mxu1 }
 0x1b6   : > { %5292 = vst [vmem:[#allocation10_spill] sm:$0xff] %v4891_v33  ;;  %v4897_v61 = vpop.f32.mrf.mxu0 }
 0x1b7   : > { %v4895_v32 = vpop.f32.mrf.mxu1 }
 0x1b8   : > { %5293 = vst [vmem:[#allocation25_spill] sm:$0xff] %v4895_v32  ;;  %v4901_v25 = vpop.f32.mrf.mxu0 }
 0x1b9   : > { %v4899_v56 = vpop.f32.mrf.mxu1 }
 0x1ba   : > { %v4905_v62 = vpop.f32.mrf.mxu0 }
 0x1bb   : > { %v4903_v29 = vpop.f32.mrf.mxu1 }
 0x1bc   : > { %5294 = vst [vmem:[#allocation11_spill] sm:$0xff] %v4903_v29  ;;  %v4909_v57 = vpop.f32.mrf.mxu0 }
 0x1bd   : > { %v4907_v26 = vpop.f32.mrf.mxu1 }
 0x1be   : > { %5295 = vst [vmem:[#allocation26_spill] sm:$0xff] %v4907_v26  ;;  %v4913_v30 = vpop.f32.mrf.mxu0 }
 0x1bf   : > { %v4911_v35 = vpop.f32.mrf.mxu1 }
 0x1c0   : > { %5296 = vst [vmem:[#allocation12_spill] sm:$0xff] %v4911_v35  ;;  %v4917_v18 = vpop.f32.mrf.mxu0 }
 0x1c1   : > { %v4915_v31 = vpop.f32.mrf.mxu1 }
 0x1c2   : > { %5297 = vst [vmem:[#allocation27_spill] sm:$0xff] %v4915_v31  ;;  %v4921_v34 = vpop.f32.mrf.mxu0 }
 0x1c3   : > { %v4919_v45 = vpop.f32.mrf.mxu1 }
 0x1c4   : > { %5298 = vst [vmem:[#allocation13_spill] sm:$0xff] %v4919_v45  ;;  %v4925_v5 = vpop.f32.mrf.mxu0 }
 0x1c5   : > { %v4923_v0 = vpop.f32.mrf.mxu1 }
 0x1c6   : > { %5299 = vst [vmem:[#allocation28_spill] sm:$0xff] %v4923_v0  ;;  %v4929_v40 = vpop.f32.mrf.mxu0 }
 0x1c7   : > { %v4927_v2 = vpop.f32.mrf.mxu1 }
 0x1c8   : > { %5300 = vst [vmem:[#allocation14_spill] sm:$0xff] %v4927_v2  ;;  %v4931_v8 = vpop.f32.mrf.mxu0 }
 0x1c9   : > { %v2653_v39 = vpop.f32.mrf.mxu1 }
 0x1ca   : > { %v4933_v22 = vpop.f32.mrf.mxu0 }
 0x1cb   : > { %5301 = vst [vmem:[#allocation29_spill] sm:$0xff] %v4933_v22  ;;  %v2655_v49 = vpop.f32.mrf.mxu1 }
 0x1cc   : > { %v4935_v19 = vpop.f32.mrf.mxu0 }
 0x1cd   : > { %5302 = vst [vmem:[#allocation15_spill] sm:$0xff] %v4935_v19  ;;  %v2657_v43 = vpop.f32.mrf.mxu1 }
 0x1ce   : > { %v4937_v3 = vpop.f32.mrf.mxu0 }
 0x1cf   : > { %5303 = vst [vmem:[#allocation30_spill] sm:$0xff] %v4937_v3  ;;  %v2659_v16 = vpop.f32.mrf.mxu1 }
 0x1d0   : > { %v4939_v20 = vpop.f32.mrf.mxu0 }
 0x1d1   : > { %5304 = vst [vmem:[#allocation16_spill] sm:$0xff] %v4939_v20  ;;  %v2663_v42 = vpop.f32.mrf.mxu1 }
 0x1d2   : > { %v4941_v59 = vpop.f32.mrf.mxu0 }
 0x1d3   : > { %5305 = vst [vmem:[#allocation31_spill] sm:$0xff] %v4941_v59  ;;  %v2665_v17 = vpop.f32.mrf.mxu1 }
 0x1d4   : > { %v4943_v13 = vpop.f32.mrf.mxu0 }
 0x1d5   : > { %5306 = vst [vmem:[#allocation17_spill] sm:$0xff] %v4943_v13  ;;  %v2667_v58 = vpop.f32.mrf.mxu1 }
 0x1d6   : > { %v4945_v2 = vpop.f32.mrf.mxu0 }
 0x1d7   : > { %5307 = vst [vmem:[#allocation32_spill] sm:$0xff] %v4945_v2  ;;  %v2669_v32 = vpop.f32.mrf.mxu1 }
 0x1d8   : > { %v4947_v0 = vpop.f32.mrf.mxu0 }
 0x1d9   : > { %v4949_v33 = vpop.f32.mrf.mxu1 }
 0x1da   : > { %v4951_v45 = vpop.f32.mrf.mxu0 }
 0x1db   : > { %5308 = vst [vmem:[#allocation18_spill] sm:$0xff] %v4951_v45  ;;  %v4953_v1 = vpop.f32.mrf.mxu1 }
 0x1dc   : > { %v4955_v31 = vpop.f32.mrf.mxu0 }
 0x1dd   : > { %5309 = vst [vmem:[#allocation33_spill] sm:$0xff] %v4955_v31  ;;  %v4957_v20 = vpop.f32.mrf.mxu1  ;;  %v2301_v31 = vadd.f32 %v4866_v28, %v4757_v9  ;;  %v2307_v28 = vadd.f32 %v4881_v51, %v4778_v53  ;;  %v2313_v53 = vadd.f32 %v4889_v14, %v4792_v55  ;;  %v2317_v14 = vadd.f32 %v4897_v61, %v4806_v36 }
 0x1de   : > { %v4959_v59 = vpop.f32.mrf.mxu0  ;;  %v2323_v61 = vadd.f32 %v4905_v62, %v4820_v48 }
 0x1df   : > { %5310 = vst [vmem:[#allocation19_spill] sm:$0xff] %v4959_v59  ;;  %v4961_v23 = vpop.f32.mrf.mxu1  ;;  %v2654_v6 = vadd.f32 %v2653_v39, %v2301_v31 }
 0x1e0   : > { %v4963_v13 = vpop.f32.mrf.mxu0 }
 0x1e1   : > { %5311 = vst [vmem:[#allocation34_spill] sm:$0xff] %v4963_v13  ;;  %v4965_v2 = vpop.f32.mrf.mxu1  ;;  %v2303_v13 = vadd.f32 %v4872_v7, %v4764_v50 }
 0x1e2   : > { %v4967_v35 = vpop.f32.mrf.mxu0 }
 0x1e3   : > { %5312 = vst [vmem:[#allocation20_spill] sm:$0xff] %v4967_v35  ;;  %v4969_v3 = vpop.f32.mrf.mxu1  ;;  %v2656_v29 = vadd.f32 %v2655_v49, %v2303_v13 }
 0x1e4   : > { %v4971_v24 = vpop.f32.mrf.mxu0 }
 0x1e5   : > { %5313 = vst [vmem:[#allocation35_spill] sm:$0xff] %v4971_v24  ;;  %v4973_v26 = vpop.f32.mrf.mxu1  ;;  %v2305_v24 = vadd.f32 %v4877_v37, %v4771_v46  ;;  %v2660_v46 = vadd.f32 %v2659_v16, %v2307_v28 }
 0x1e6   : > { %v4977_v19 = vpop.f32.mrf.mxu0 }
 0x1e7   : > { %5314 = vst [vmem:[#allocation21_spill] sm:$0xff] %v4977_v19  ;;  %v4979_v59 = vpop.f32.mrf.mxu1  ;;  %v2658_v19 = vadd.f32 %v2657_v43, %v2305_v24 }
 0x1e8   : > { %v2766_v35 = vpop.f32.mrf.mxu0 }
 0x1e9   : > { %v4983_v45 = vpop.f32.mrf.mxu1  ;;  %v2767_v22 = vadd.f32 %v2766_v35, %v2654_v6 }
 0x1ea   : > { %5315 = vst [vmem:[#allocation36_spill] sm:$0xff] %v4983_v45  ;;  %v2768_v9 = vpop.f32.mrf.mxu0  ;;  %v2311_v45 = vadd.f32 %v4885_v10, %v4785_v38  ;;  %v2315_v10 = vadd.f32 %v4893_v21, %v4799_v11  ;;  %v2321_v21 = vadd.f32 %v4901_v25, %v4813_v41 }
 0x1eb   : > { %v4987_v63 = vpop.f32.mrf.mxu1  ;;  %v2845_v50 = vadd.f32 %v2767_v22, %v4647_v15  ;;  %v2769_v7 = vadd.f32 %v2768_v9, %v2656_v29 }
 0x1ec   : > { %v2770_v39 = vpop.f32.mrf.mxu0  ;;  %v2664_v24 = vadd.f32 %v2663_v42, %v2311_v45  ;;  %v2668_v45 = vadd.f32 %v2667_v58, %v2315_v10  ;;  %v2674_v58 = vadd.f32 %v4949_v33, %v2321_v21  ;;  %v2327_v33 = vadd.f32 %v4913_v30, %v4834_v27 }
 0x1ed   : > { %v4992_v31 = vpop.f32.mrf.mxu1  ;;  %3265 = vst [vmem:[%s4664_s21 + $0x20] sm:$0xff] %v2845_v50  ;;  %v2846_v6 = vadd.f32 %v2769_v7, %v4653_v4  ;;  %v2771_v37 = vadd.f32 %v2770_v39, %v2658_v19  ;;  %v2666_v19 = vadd.f32 %v2665_v17, %v2313_v53  ;;  %v2670_v17 = vadd.f32 %v2669_v32, %v2317_v14 }
 0x1ee   : > { %v2772_v49 = vpop.f32.mrf.mxu0  ;;  %v2325_v32 = vadd.f32 %v4909_v57, %v4827_v52 }
 0x1ef   : > { %v4998_v35 = vpop.f32.mrf.mxu1  ;;  %3266 = vst [vmem:[%s4664_s21 + $0x28] sm:$0xff] %v2846_v6  ;;  %v2847_v51 = vadd.f32 %v2771_v37, %v4647_v15  ;;  %v2773_v29 = vadd.f32 %v2772_v49, %v2660_v46  ;;  %v2676_v37 = vadd.f32 %v4953_v1, %v2323_v61  ;;  %v2331_v1 = vadd.f32 %v4917_v18, %v4841_v54  ;;  %v5318_v61 = vld [vmem:[#allocation11_spill] sm:$0xff] }
 0x1f0   : > { %v2776_v38 = vpop.f32.mrf.mxu0 }
 0x1f1   : > { %v5004_v22 = vpop.f32.mrf.mxu1  ;;  %3267 = vst [vmem:[%s4664_s21 + $0x30] sm:$0xff] %v2847_v51  ;;  %v2848_v43 = vadd.f32 %v2773_v29, %v4653_v4  ;;  %v2777_v16 = vadd.f32 %v2776_v38, %v2664_v24  ;;  %v2678_v24 = vadd.f32 %v4957_v20, %v2325_v32  ;;  %v2680_v38 = vadd.f32 %v4961_v23, %v2327_v33 }
 0x1f2   : > { %v2778_v55 = vpop.f32.mrf.mxu0  ;;  %v2333_v20 = vadd.f32 %v4921_v34, %v4848_v12  ;;  %v2335_v23 = vadd.f32 %v4925_v5, %v4855_v44  ;;  %v2341_v5 = vadd.f32 %v4931_v8, %v4864_v47 }
 0x1f3   : > { %v5010_v13 = vpop.f32.mrf.mxu1  ;;  %3268 = vst [vmem:[%s4664_s21 + $0x38] sm:$0xff] %v2848_v43  ;;  %v2849_v42 = vadd.f32 %v2777_v16, %v4647_v15  ;;  %v2779_v9 = vadd.f32 %v2778_v55, %v2666_v19  ;;  %v2684_v43 = vadd.f32 %v4965_v2, %v2331_v1 }
 0x1f4   : > { %v2780_v11 = vpop.f32.mrf.mxu0  ;;  %v2686_v14 = vadd.f32 %v4969_v3, %v2333_v20  ;;  %v5327_v20 = vld [vmem:[#allocation12_spill] sm:$0xff] }
 0x1f5   : > { %v5016_v28 = vpop.f32.mrf.mxu1  ;;  %3269 = vst [vmem:[%s4664_s21 + $0x60] sm:$0xff] %v2849_v42  ;;  %v2850_v50 = vadd.f32 %v2779_v9, %v4653_v4  ;;  %v2781_v7 = vadd.f32 %v2780_v11, %v2668_v45  ;;  %v2337_v42 = vadd.f32 %v4929_v40, %v4860_v60  ;;  %v2688_v9 = vadd.f32 %v4973_v26, %v2335_v23  ;;  %v5316_v40 = vld [vmem:[#allocation8_spill] sm:$0xff] }
 0x1f6   : > { %v2782_v36 = vpop.f32.mrf.mxu0 }
 0x1f7   : > { %v5022_v39 = vpop.f32.mrf.mxu1  ;;  %3270 = vst [vmem:[%s4664_s21 + $0x68] sm:$0xff] %v2850_v50  ;;  %v2851_v46 = vadd.f32 %v2781_v7, %v4647_v15  ;;  %v2783_v6 = vadd.f32 %v2782_v36, %v2670_v17  ;;  %v2361_v17 = vadd.f32 %v4947_v0, %v4899_v56  ;;  %v2690_v50 = vadd.f32 %v4979_v59, %v2337_v42  ;;  %v5317_v7 = vld [vmem:[#allocation29_spill] sm:$0xff]  ;;  %v5330_v42 = vld [vmem:[#allocation16_spill] sm:$0xff] }
 0x1f8   : > { %v2786_v25 = vpop.f32.mrf.mxu0  ;;  %v2343_v36 = vadd.f32 %v5317_v7, %v5316_v40  ;;  %v5321_v59 = vld [vmem:[#allocation37_spill] sm:$0xff]  ;;  %v5333_v7 = vld [vmem:[#allocation24_spill] sm:$0xff] }
 0x1f9   : > { %v2713_v41 = vpop.f32.mrf.mxu1  ;;  %3271 = vst [vmem:[%s4664_s21 + $0x70] sm:$0xff] %v2851_v46  ;;  %v2852_v49 = vadd.f32 %v2783_v6, %v4653_v4  ;;  %v2787_v53 = vadd.f32 %v2786_v25, %v2674_v58  ;;  %v5319_v58 = vld [vmem:[#allocation18_spill] sm:$0xff]  ;;  %v5320_v6 = vld [vmem:[#allocation36_spill] sm:$0xff] }
 0x1fa   : > { %v2788_v62 = vpop.f32.mrf.mxu0  ;;  %v2363_v46 = vadd.f32 %v5319_v58, %v5318_v61  ;;  %v2694_v25 = vadd.f32 %v5320_v6, %v2341_v5  ;;  %v2714_v32 = vadd.f32 %v2713_v41, %v2361_v17  ;;  %v5335_v58 = vld [vmem:[#allocation13_spill] sm:$0xff] }
 0x1fb   : > { %v2715_v48 = vpop.f32.mrf.mxu1  ;;  %3272 = vst [vmem:[%s4664_s21 + $0x78] sm:$0xff] %v2852_v49  ;;  %v2853_v51 = vadd.f32 %v2787_v53, %v4647_v15  ;;  %v2789_v29 = vadd.f32 %v2788_v62, %v2676_v37  ;;  %v5322_v37 = vld [vmem:[#allocation15_spill] sm:$0xff]  ;;  %v5323_v53 = vld [vmem:[#allocation26_spill] sm:$0xff]  ;;  %v5324_v62 = vld [vmem:[#allocation33_spill] sm:$0xff] }
 0x1fc   : > { %v2790_v57 = vpop.f32.mrf.mxu0  ;;  %v2345_v49 = vadd.f32 %v5322_v37, %v5321_v59  ;;  %v2365_v33 = vadd.f32 %v5324_v62, %v5323_v53  ;;  %v5337_v37 = vld [vmem:[#allocation10_spill] sm:$0xff]  ;;  %v5340_v62 = vld [vmem:[#allocation35_spill] sm:$0xff] }
 0x1fd   : > { %v2717_v52 = vpop.f32.mrf.mxu1  ;;  %3273 = vst [vmem:[%s4664_s21 + $0xa0] sm:$0xff] %v2853_v51  ;;  %v2854_v10 = vadd.f32 %v2789_v29, %v4653_v4  ;;  %v2791_v19 = vadd.f32 %v2790_v57, %v2678_v24  ;;  %v2696_v24 = vadd.f32 %v4987_v63, %v2343_v36  ;;  %v2716_v57 = vadd.f32 %v2715_v48, %v2363_v46  ;;  %v5334_v36 = vld [vmem:[#allocation31_spill] sm:$0xff] }
 0x1fe   : > { %v2792_v30 = vpop.f32.mrf.mxu0  ;;  %v2353_v61 = vadd.f32 %v5334_v36, %v5333_v7 }
 0x1ff   : > { %v2719_v27 = vpop.f32.mrf.mxu1  ;;  %3274 = vst [vmem:[%s4664_s21 + $0xa8] sm:$0xff] %v2854_v10  ;;  %v2855_v16 = vadd.f32 %v2791_v19, %v4647_v15  ;;  %v2793_v55 = vadd.f32 %v2792_v30, %v2680_v38  ;;  %v5325_v10 = vld [vmem:[#allocation23_spill] sm:$0xff]  ;;  %v5326_v19 = vld [vmem:[#allocation30_spill] sm:$0xff] }
 0x200   : > { %v2796_v18 = vpop.f32.mrf.mxu0  ;;  %v2347_v30 = vadd.f32 %v5326_v19, %v5325_v10  ;;  %v5341_v10 = vld [vmem:[#allocation25_spill] sm:$0xff]  ;;  %v5342_v19 = vld [vmem:[#allocation32_spill] sm:$0xff] }
 0x201   : > { %v5049_v54 = vpop.f32.mrf.mxu1  ;;  %3275 = vst [vmem:[%s4664_s21 + $0xb0] sm:$0xff] %v2855_v16  ;;  %v2856_v45 = vadd.f32 %v2793_v55, %v4653_v4  ;;  %v2797_v12 = vadd.f32 %v2796_v18, %v2684_v43  ;;  %v5328_v43 = vld [vmem:[#allocation19_spill] sm:$0xff]  ;;  %v2698_v55 = vadd.f32 %v4992_v31, %v2345_v49  ;;  %v2718_v18 = vadd.f32 %v2717_v52, %v2365_v33  ;;  %v5338_v49 = vld [vmem:[#allocation17_spill] sm:$0xff] }
 0x202   : > { %v2798_v2 = vpop.f32.mrf.mxu0  ;;  %v2367_v16 = vadd.f32 %v5328_v43, %v5327_v20  ;;  %v2355_v53 = vadd.f32 %v5338_v49, %v5337_v37  ;;  %v2706_v33 = vadd.f32 %v5010_v13, %v2353_v61  ;;  %v5343_v20 = vld [vmem:[#allocation14_spill] sm:$0xff]  ;;  %v5344_v43 = vld [vmem:[#allocation21_spill] sm:$0xff] }
 0x203   : > { %v5056_v34 = vpop.f32.mrf.mxu1  ;;  %3276 = vst [vmem:[%s4664_s21 + $0xb8] sm:$0xff] %v2856_v45  ;;  %v2857_v11 = vadd.f32 %v2797_v12, %v4647_v15  ;;  %v2799_v44 = vadd.f32 %v2798_v2, %v2686_v14  ;;  %v5329_v2 = vld [vmem:[#allocation9_spill] sm:$0xff]  ;;  %v2377_v13 = vadd.f32 %v5344_v43, %v5343_v20 }
 0x204   : > { %v2800_v21 = vpop.f32.mrf.mxu0  ;;  %v2720_v31 = vadd.f32 %v2719_v27, %v2367_v16 }
 0x205   : > { %v5065_v3 = vpop.f32.mrf.mxu1  ;;  %3277 = vst [vmem:[%s4664_s21 + $0xe0] sm:$0xff] %v2857_v11  ;;  %v2858_v60 = vadd.f32 %v2799_v44, %v4653_v4  ;;  %v2801_v26 = vadd.f32 %v2800_v21, %v2688_v9  ;;  %v2351_v9 = vadd.f32 %v5330_v42, %v5329_v2  ;;  %v5331_v11 = vld [vmem:[#allocation27_spill] sm:$0xff]  ;;  %v5332_v44 = vld [vmem:[#allocation34_spill] sm:$0xff]  ;;  %v2700_v21 = vadd.f32 %v4998_v35, %v2347_v30  ;;  %v5336_v35 = vld [vmem:[#allocation20_spill] sm:$0xff] }
 0x206   : > { %v2802_v8 = vpop.f32.mrf.mxu0  ;;  %v2371_v5 = vadd.f32 %v5332_v44, %v5331_v11  ;;  %v2373_v46 = vadd.f32 %v5336_v35, %v5335_v58  ;;  %v2357_v30 = vadd.f32 %v5342_v19, %v5341_v10 }
 0x207   : > { %v5076_v47 = vpop.f32.mrf.mxu1  ;;  %3278 = vst [vmem:[%s4664_s21 + $0xe8] sm:$0xff] %v2858_v60  ;;  %v2859_v56 = vadd.f32 %v2801_v26, %v4647_v15  ;;  %v2803_v0 = vadd.f32 %v2802_v8, %v2690_v50  ;;  %v2704_v27 = vadd.f32 %v5004_v22, %v2351_v9  ;;  %v5339_v22 = vld [vmem:[#allocation28_spill] sm:$0xff] }
 0x208   : > { %v2806_v51 = vpop.f32.mrf.mxu0  ;;  %v2724_v8 = vadd.f32 %v5049_v54, %v2371_v5  ;;  %v2375_v54 = vadd.f32 %v5340_v62, %v5339_v22 }
 0x209   : > { %v2826_v29 = vpop.f32.mrf.mxu1  ;;  %3279 = vst [vmem:[%s4664_s21 + $0xf0] sm:$0xff] %v2859_v56  ;;  %v2860_v1 = vadd.f32 %v2803_v0, %v4653_v4  ;;  %v2807_v41 = vadd.f32 %v2806_v51, %v2694_v25 }
 0x20a   : > { %v2827_v38 = vadd.f32 %v2826_v29, %v2714_v32  ;;  %v2808_v63 = vpop.f32.mrf.mxu0  ;;  %v2728_v16 = vadd.f32 %v5065_v3, %v2375_v54 }
 0x20b   : > { %v2828_v23 = vpop.f32.mrf.mxu1  ;;  %3280 = vst [vmem:[%s4664_s21 + $0xf8] sm:$0xff] %v2860_v1  ;;  %v2861_v48 = vadd.f32 %v2807_v41, %v4647_v15  ;;  %v2809_v45 = vadd.f32 %v2808_v63, %v2696_v24  ;;  %v2726_v24 = vadd.f32 %v5056_v34, %v2373_v46  ;;  %v2708_v34 = vadd.f32 %v5016_v28, %v2355_v53 }
 0x20c   : > { %v2869_v14 = vadd.f32 %v2827_v38, %v4647_v15  ;;  %v2829_v12 = vadd.f32 %v2828_v23, %v2716_v57  ;;  %v2810_v52 = vpop.f32.mrf.mxu0  ;;  %v2730_v28 = vadd.f32 %v5076_v47, %v2377_v13 }
 0x20d   : > { %v2830_v17 = vpop.f32.mrf.mxu1  ;;  %3281 = vst [vmem:[%s4664_s21 + $0x120] sm:$0xff] %v2861_v48  ;;  %v2862_v50 = vadd.f32 %v2809_v45, %v4653_v4  ;;  %v2811_v26 = vadd.f32 %v2810_v52, %v2698_v55  ;;  %v2710_v45 = vadd.f32 %v5022_v39, %v2357_v30 }
 0x20e   : > { %3289 = vst [vmem:[%s4664_s21 + $0x1a0] sm:$0xff] %v2869_v14  ;;  %v2870_v60 = vadd.f32 %v2829_v12, %v4653_v4  ;;  %v2831_v40 = vadd.f32 %v2830_v17, %v2718_v18  ;;  %v2812_v6 = vpop.f32.mrf.mxu0 }
 0x20f   : > { %v2832_v25 = vpop.f32.mrf.mxu1  ;;  %3282 = vst [vmem:[%s4664_s21 + $0x128] sm:$0xff] %v2862_v50  ;;  %v2863_v32 = vadd.f32 %v2811_v26, %v4647_v15  ;;  %v2813_v0 = vadd.f32 %v2812_v6, %v2700_v21 }
 0x210   : > { %3290 = vst [vmem:[%s4664_s21 + $0x1a8] sm:$0xff] %v2870_v60  ;;  %v2871_v56 = vadd.f32 %v2831_v40, %v4647_v15  ;;  %v2833_v59 = vadd.f32 %v2832_v25, %v2720_v31  ;;  %v2816_v51 = vpop.f32.mrf.mxu0 }
 0x211   : > { %v2836_v29 = vpop.f32.mrf.mxu1  ;;  %3283 = vst [vmem:[%s4664_s21 + $0x130] sm:$0xff] %v2863_v32  ;;  %v2864_v57 = vadd.f32 %v2813_v0, %v4653_v4  ;;  %v2817_v41 = vadd.f32 %v2816_v51, %v2704_v27 }
 0x212   : > { %3291 = vst [vmem:[%s4664_s21 + $0x1b0] sm:$0xff] %v2871_v56  ;;  %v2872_v1 = vadd.f32 %v2833_v59, %v4653_v4  ;;  %v2837_v38 = vadd.f32 %v2836_v29, %v2724_v8  ;;  %v2818_v55 = vpop.f32.mrf.mxu0 }
 0x213   : > { %v2838_v18 = vpop.f32.mrf.mxu1  ;;  %3284 = vst [vmem:[%s4664_s21 + $0x138] sm:$0xff] %v2864_v57  ;;  %v2865_v63 = vadd.f32 %v2817_v41, %v4647_v15  ;;  %v2819_v48 = vadd.f32 %v2818_v55, %v2706_v33 }
 0x214   : > { %3292 = vst [vmem:[%s4664_s21 + $0x1b8] sm:$0xff] %v2872_v1  ;;  %v2873_v23 = vadd.f32 %v2837_v38, %v4647_v15  ;;  %v2839_v14 = vadd.f32 %v2838_v18, %v2726_v24  ;;  %v2820_v12 = vpop.f32.mrf.mxu0 }
 0x215   : > { %v2840_v3 = vpop.f32.mrf.mxu1  ;;  %3285 = vst [vmem:[%s4664_s21 + $0x160] sm:$0xff] %v2865_v63  ;;  %v2866_v2 = vadd.f32 %v2819_v48, %v4653_v4  ;;  %v2821_v9 = vadd.f32 %v2820_v12, %v2708_v34 }
 0x216   : > { %3293 = vst [vmem:[%s4664_s21 + $0x1e0] sm:$0xff] %v2873_v23  ;;  %v2874_v42 = vadd.f32 %v2839_v14, %v4653_v4  ;;  %v2841_v11 = vadd.f32 %v2840_v3, %v2728_v16  ;;  %v2822_v44 = vpop.f32.mrf.mxu0 }
 0x217   : > { %v2842_v39 = vpop.f32.mrf.mxu1  ;;  %3286 = vst [vmem:[%s4664_s21 + $0x168] sm:$0xff] %v2866_v2  ;;  %v2867_v47 = vadd.f32 %v2821_v9, %v4647_v15  ;;  %v2823_v21 = vadd.f32 %v2822_v44, %v2710_v45 }
 0x218   : > { %3294 = vst [vmem:[%s4664_s21 + $0x1e8] sm:$0xff] %v2874_v42  ;;  %v2875_v5 = vadd.f32 %v2841_v11, %v4647_v15  ;;  %v2843_v31 = vadd.f32 %v2842_v39, %v2730_v28 }
 0x219   : > { %3287 = vst [vmem:[%s4664_s21 + $0x170] sm:$0xff] %v2867_v47  ;;  %v2868_v52 = vadd.f32 %v2823_v21, %v4653_v4 }
 0x21a   : > { %3295 = vst [vmem:[%s4664_s21 + $0x1f0] sm:$0xff] %v2875_v5  ;;  %v2876_v17 = vadd.f32 %v2843_v31, %v4653_v4 }
 0x21b   : > { %3288 = vst [vmem:[%s4664_s21 + $0x178] sm:$0xff] %v2868_v52 }
 0x21c   : > { %3296 = vst [vmem:[%s4664_s21 + $0x1f8] sm:$0xff] %v2876_v17 }
 0x21d   : > { %3747 = shalt.err (!%p3744_p6)
}
 0x21e   : > { %s3748_s9 = scalar_lea.hbm %s5151_s4, 8192  ;;  %s3752_s24 = scalar_lea.hbm %s5217_s3, 32768 }
 0x21f   : > { %p3749_p7 = scmp.ne.s32.totalorder %s5151_s4, %s3748_s9  ;;  %p3753_p13 = scmp.lt.s32.totalorder %s5151_s4, %s5217_s3 }
 0x220   : > { %p3754_p0 = scmp.lt.s32.totalorder %s3752_s24, %s3748_s9 }
 0x221   : > { %p3750_p9 = pnand %p3749_p7, %p3911_p3 }
 0x222   : > { %p3755_p10 = por %p3754_p0, %p3753_p13 }
 0x223   : > { %p3751_p11 = pneg %p3750_p9 }
 0x225   : > { %p3756_p12 = pnand %p3755_p10, %p3751_p11 }
 0x227   : > { %3759 = shalt.err (!%p3756_p12)
}
 0x228   : > { %s3837_s16 = smov 256   ;;  %s3838_s29 = smov 16  }
 0x229   : > { %3327 = dma.vmem_to_hbm [thread:$0]  (%p3911_p3), %s5153_s28, 8192, %s5151_s4, %s5163_s6, %s3837_s16, %s3837_s16, %s3838_s29  }
 0x22a PF: > { %p3339_p1 = scmp.ge.s32.totalorder %s3830_s19, 2  ;;  %s2942_s30 = sand.u32 1, %s3802_s12  }
 0x22b   : > { %s2943_s7 = scalar_lea.sflag [#allocation4], %s2942_s30 }
 0x22c   : > { %p3334_p2 = pnand %p3339_p1, %p3920_p8 }
 0x22e   : > { %p3335_p4 = pneg %p3334_p2 }
 0x230   : > { %3797 = dma.done.wait (%p3335_p4), %s2943_s7, 8192  }
 0x231   : > { %3799 = vsyncadd (%p3335_p4), %s2943_s7, 4294959104  ;;  %s17_s19 = sadd.s32 1, %s3830_s19   ;;  %s5345_s12 = smov %s3806_s13 }
 0x232   : > { %p14_p5 = scmp.ge.s32.totalorder %s17_s19, 6   ;;  %s5346_s13 = smov %s3810_s14 }
 0x233   : > { %s5347_s14 = smov %s3938_s5  ;;  %s5348_s15 = smov %s3822_s17 }
 0x234   : > { %s5349_s16 = smov %s3826_s18  ;;  %s5350_s17 = smov %s5353_s22 }
 0x235   : > { %s5351_s18 = smov %s5357_s23  ;;  %16 = sbr.rel (!%p14_p5) target bundleno = 6 (0x6), region = 76 }
 0x23a   :  { %2948 = vsyncpa [#allocation3], 1 }
 0x23b   :  { %2950 = vsyncpa [#allocation3 + $0x1], 1 }
 0x23c   :  { %2951 = vsyncpa [#allocation4], 1 }
 0x23d   :  { %2953 = vsyncpa [#allocation4 + $0x1], 1 }

</bundles_post_ra>
